<compile_context>
chip_gen: v7x
topology: tpu7x:2x2x1
jax: 0.10.0
libtpu: 0.0.40
codegen_flags: <defaults>
</compile_context>

<pallas_src>
import jax
import jax.numpy as jnp
from jax.experimental import pallas as pl
from jax.experimental.pallas import tpu as pltpu

H = 768           # GPT2 / ViT hidden size
D = 512           # intermediate / SE / BatchNorm width
C = 18            # num_class
C_PAD = 128       # lane-padded classifier width
BN_EPS = 1e-5     # PyTorch BatchNorm1d default eps


def pitvqa_head_kernel(pooled_ref, w_ref, vecs_ref, wc_ref, out_ref):
    # pooled: (B, H) bf16 — already mean-pooled over the sequence in the wrapper.
    vecs = vecs_ref[...]                                       # (3, D) f32
    b1 = vecs[0:1, :]
    bse = vecs[1:2, :]
    bc = vecs[2:3, :C_PAD]                                     # (1, C_PAD), BN-folded

    w1 = w_ref[0:H, :]                                         # (H, D) bf16
    wse = w_ref[H:, :]                                         # (D, D) bf16

    # intermediate_layer: Linear(768 -> 512); bf16 MXU operands, f32 accumulate.
    out = jnp.dot(pooled_ref[...], w1,
                  preferred_element_type=jnp.float32) + b1     # (B, D) f32

    # se_layer: out * sigmoid(Linear(512 -> 512)(out))
    se = jax.nn.sigmoid(
        jnp.dot(out.astype(jnp.bfloat16), wse,
                preferred_element_type=jnp.float32) + bse)
    out = out * se

    # BatchNorm1d(512): training-mode batch statistics over B, two-pass variance.
    # (Whole batch lives in this single block, so stats are exact.)
    mu = jnp.mean(out, axis=0, keepdims=True)
    cen = out - mu
    var = jnp.mean(cen * cen, axis=0, keepdims=True)
    out = cen * jax.lax.rsqrt(var + BN_EPS)
    # gamma / beta were folded into wc / bc at pack time.

    # TODO(synk): Dropout(p=0.2) left as identity (eval semantics); stochastic
    # masking would need pltpu.prng_* and has no deterministic torch reference.

    # classifier: Linear(512 -> 18), lane-padded to 128 output lanes.
    logits = jnp.dot(out.astype(jnp.bfloat16), wc_ref[...],
                     preferred_element_type=jnp.float32) + bc
    out_ref[...] = logits


def pack_params(w1, b1, wse, bse, gamma, beta, wc, bc):
    """One-time host-side packing: stack / fold / pad / cast to kernel layout."""
    w_stack = jnp.concatenate([w1, wse], axis=0).astype(jnp.bfloat16)    # (H+D, D)

    # Fold the BatchNorm affine into the classifier (numerically equivalent):
    #   (h * gamma + beta) @ wc + bc  ==  h @ (gamma[:,None] * wc) + (beta @ wc + bc)
    wc_fold = gamma.reshape(D, 1) * wc                                   # (D, C)
    bc_fold = beta.reshape(1, D) @ wc + bc                               # (1, C)

    bc_pad = jnp.zeros((D,), jnp.float32).at[:C].set(bc_fold.reshape(-1))
    vecs = jnp.stack([b1.reshape(-1), bse.reshape(-1), bc_pad],
                     axis=0).astype(jnp.float32)                         # (3, D)
    wc_pad = jnp.zeros((D, C_PAD), jnp.float32).at[:, :C].set(wc_fold)
    return w_stack, vecs, wc_pad.astype(jnp.bfloat16)


def pitvqa_head(decoder_output, w_stack, vecs, wc_pad):
    """Head forward: takes gpt_decoder(...).last_hidden_state, returns logits."""
    B = decoder_output.shape[0]

    # adaptive_avg_pool1d(., 1) over the sequence, in the wrapper so XLA fuses
    # it with the decoder; the kernel only DMAs the pooled (B, H) bf16 tensor.
    pooled = jnp.mean(decoder_output.astype(jnp.float32),
                      axis=1).astype(jnp.bfloat16)                       # (B, H)

    flops = 2 * B * (H * D + D * D + D * C_PAD)
    bytes_accessed = (pooled.size * 2 + w_stack.size * 2 + vecs.size * 4
                      + wc_pad.size * 2 + B * C_PAD * 4)

    vm = pltpu.MemorySpace.VMEM
    out = pl.pallas_call(
        pitvqa_head_kernel,
        out_shape=jax.ShapeDtypeStruct((B, C_PAD), jnp.float32),
        in_specs=[pl.BlockSpec(memory_space=vm)] * 4,
        out_specs=pl.BlockSpec(memory_space=vm),
        cost_estimate=pl.CostEstimate(flops=flops,
                                      transcendentals=B * D,
                                      bytes_accessed=bytes_accessed),
    )(pooled, w_stack, vecs, wc_pad)
    return out[:, :C]


def reference_head(decoder_output, w_stack, vecs, wc_pad):
    # Same math in plain jnp/XLA, with identical bf16 quantization points.
    pooled = jnp.mean(decoder_output.astype(jnp.float32),
                      axis=1).astype(jnp.bfloat16)
    b1, bse, bc = vecs[0:1], vecs[1:2], vecs[2:3, :C_PAD]
    w1, wse = w_stack[:H], w_stack[H:]
    out = jnp.dot(pooled, w1, preferred_element_type=jnp.float32) + b1
    out = out * jax.nn.sigmoid(
        jnp.dot(out.astype(jnp.bfloat16), wse,
                preferred_element_type=jnp.float32) + bse)
    mu = jnp.mean(out, axis=0, keepdims=True)
    cen = out - mu
    var = jnp.mean(cen * cen, axis=0, keepdims=True)
    out = cen * jax.lax.rsqrt(var + BN_EPS)
    logits = jnp.dot(out.astype(jnp.bfloat16), wc_pad,
                     preferred_element_type=jnp.float32) + bc
    return logits[:, :C]


if __name__ == "__main__":
    key = jax.random.PRNGKey(0)
    ks = jax.random.split(key, 9)

    B, S = 8, 30   # batch 8, seq length 30 (tokenizer max_length=30)

    # Synthetic stand-in for gpt_decoder(...).last_hidden_state.
    # TODO(synk): ViT visual encoder, GPT2 tokenizer, BlipTextModel and GPT2Model
    # are pretrained HF modules with no in-script Pallas equivalent.
    x = jax.random.normal(ks[0], (B, S, H), jnp.float32)

    # Deterministic parameter init (shapes per the module's __init__).
    w1    = jax.random.normal(ks[1], (H, D), jnp.float32) * 0.02
    b1    = jax.random.normal(ks[2], (1, D), jnp.float32) * 0.02
    wse   = jax.random.normal(ks[3], (D, D), jnp.float32) * 0.02
    bse   = jax.random.normal(ks[4], (1, D), jnp.float32) * 0.02
    gamma = jnp.ones((1, D), jnp.float32)      # BatchNorm1d affine weight init
    beta  = jnp.zeros((1, D), jnp.float32)     # BatchNorm1d affine bias init
    wc    = jax.random.normal(ks[5], (D, C), jnp.float32) * 0.02
    bc    = jax.random.normal(ks[6], (1, C), jnp.float32) * 0.02

    # One-time packing / BN-folding / bf16 casting of the DMA payload.
    w_stack, vecs, wc_pad = pack_params(w1, b1, wse, bse, gamma, beta, wc, bc)

    out = pitvqa_head(x, w_stack, vecs, wc_pad)
    out = jax.block_until_ready(out)
    assert out.shape == (B, C), out.shape

    ref = reference_head(x, w_stack, vecs, wc_pad)
    assert jnp.allclose(out, ref, rtol=2e-3, atol=2e-3), \
        float(jnp.max(jnp.abs(out - ref)))

    print("KERNEL_OK")
</pallas_src>

<mosaic_0001>
module attributes {stable_mosaic.version = 11 : i64} {
  func.func @pitvqa_head_kernel(%arg0: memref<8x768xbf16, #tpu.memory_space<vmem>>, %arg1: memref<1280x512xbf16, #tpu.memory_space<vmem>>, %arg2: memref<3x512xf32, #tpu.memory_space<vmem>>, %arg3: memref<512x128xbf16, #tpu.memory_space<vmem>>, %arg4: memref<8x128xf32, #tpu.memory_space<vmem>>) attributes {dimension_semantics = [], scalar_prefetch = 0 : i64, scratch_operands = 0 : i64, tpu.core_type = #tpu.core_type<tc>} {
    %c0 = arith.constant 0 : index
    %c0_0 = arith.constant 0 : index
    %0 = vector.load %arg2[%c0, %c0_0] : memref<3x512xf32, #tpu.memory_space<vmem>>, vector<3x512xf32>
    %1 = vector.extract_strided_slice %0 {offsets = [0, 0], sizes = [1, 512], strides = [1, 1]} : vector<3x512xf32> to vector<1x512xf32>
    %2 = vector.extract_strided_slice %0 {offsets = [1, 0], sizes = [1, 512], strides = [1, 1]} : vector<3x512xf32> to vector<1x512xf32>
    %3 = vector.extract_strided_slice %0 {offsets = [2, 0], sizes = [1, 128], strides = [1, 1]} : vector<3x512xf32> to vector<1x128xf32>
    %c0_1 = arith.constant 0 : index
    %c0_2 = arith.constant 0 : index
    %4 = vector.load %arg1[%c0_1, %c0_2] : memref<1280x512xbf16, #tpu.memory_space<vmem>>, vector<768x512xbf16>
    %c768 = arith.constant 768 : index
    %c0_3 = arith.constant 0 : index
    %5 = vector.load %arg1[%c768, %c0_3] : memref<1280x512xbf16, #tpu.memory_space<vmem>>, vector<512x512xbf16>
    %c0_4 = arith.constant 0 : index
    %c0_5 = arith.constant 0 : index
    %6 = vector.load %arg0[%c0_4, %c0_5] : memref<8x768xbf16, #tpu.memory_space<vmem>>, vector<8x768xbf16>
    %cst = arith.constant dense<0.000000e+00> : vector<8x512xf32>
    %7 = tpu.matmul %6, %4, %cst {dimension_numbers = #tpu.dot_dimension_numbers<[1], [0], [0], [1], [0, 0, 1, 1], [], []>} : vector<8x768xbf16>, vector<768x512xbf16>, vector<8x512xf32> -> vector<8x512xf32>
    %8 = vector.broadcast %1 : vector<1x512xf32> to vector<8x512xf32>
    %9 = arith.addf %7, %8 : vector<8x512xf32>
    %10 = arith.truncf %9 : vector<8x512xf32> to vector<8x512xbf16>
    %cst_6 = arith.constant dense<0.000000e+00> : vector<8x512xf32>
    %11 = tpu.matmul %10, %5, %cst_6 {dimension_numbers = #tpu.dot_dimension_numbers<[1], [0], [0], [1], [0, 0, 1, 1], [], []>} : vector<8x512xbf16>, vector<512x512xbf16>, vector<8x512xf32> -> vector<8x512xf32>
    %12 = vector.broadcast %2 : vector<1x512xf32> to vector<8x512xf32>
    %13 = arith.addf %11, %12 : vector<8x512xf32>
    %14 = arith.negf %13 : vector<8x512xf32>
    %15 = math.exp %14 : vector<8x512xf32>
    %cst_7 = arith.constant 1.000000e+00 : f32
    %16 = vector.broadcast %cst_7 : f32 to vector<8x512xf32>
    %17 = arith.addf %16, %15 : vector<8x512xf32>
    %18 = arith.divf %16, %17 : vector<8x512xf32>
    %19 = arith.mulf %9, %18 : vector<8x512xf32>
    %cst_8 = arith.constant dense<0.000000e+00> : vector<512xf32>
    %20 = vector.multi_reduction <add>, %19, %cst_8 [0] : vector<8x512xf32> to vector<512xf32>
    %21 = vector.shape_cast %20 : vector<512xf32> to vector<1x512xf32>
    %cst_9 = arith.constant 8.000000e+00 : f32
    %22 = vector.broadcast %cst_9 : f32 to vector<1x512xf32>
    %23 = arith.divf %21, %22 : vector<1x512xf32>
    %24 = vector.broadcast %23 : vector<1x512xf32> to vector<8x512xf32>
    %25 = arith.subf %19, %24 : vector<8x512xf32>
    %26 = arith.mulf %25, %25 : vector<8x512xf32>
    %cst_10 = arith.constant dense<0.000000e+00> : vector<512xf32>
    %27 = vector.multi_reduction <add>, %26, %cst_10 [0] : vector<8x512xf32> to vector<512xf32>
    %28 = vector.shape_cast %27 : vector<512xf32> to vector<1x512xf32>
    %cst_11 = arith.constant 8.000000e+00 : f32
    %29 = vector.broadcast %cst_11 : f32 to vector<1x512xf32>
    %30 = arith.divf %28, %29 : vector<1x512xf32>
    %cst_12 = arith.constant 9.99999974E-6 : f32
    %31 = vector.broadcast %cst_12 : f32 to vector<1x512xf32>
    %32 = arith.addf %30, %31 : vector<1x512xf32>
    %33 = math.rsqrt %32 : vector<1x512xf32>
    %34 = vector.broadcast %33 : vector<1x512xf32> to vector<8x512xf32>
    %35 = arith.mulf %25, %34 : vector<8x512xf32>
    %36 = arith.truncf %35 : vector<8x512xf32> to vector<8x512xbf16>
    %c0_13 = arith.constant 0 : index
    %c0_14 = arith.constant 0 : index
    %37 = vector.load %arg3[%c0_13, %c0_14] : memref<512x128xbf16, #tpu.memory_space<vmem>>, vector<512x128xbf16>
    %cst_15 = arith.constant dense<0.000000e+00> : vector<8x128xf32>
    %38 = tpu.matmul %36, %37, %cst_15 {dimension_numbers = #tpu.dot_dimension_numbers<[1], [0], [0], [1], [0, 0, 1, 1], [], []>} : vector<8x512xbf16>, vector<512x128xbf16>, vector<8x128xf32> -> vector<8x128xf32>
    %39 = vector.broadcast %3 : vector<1x128xf32> to vector<8x128xf32>
    %40 = arith.addf %38, %39 : vector<8x128xf32>
    %c0_16 = arith.constant 0 : index
    %c0_17 = arith.constant 0 : index
    %41 = vector.load %arg4[%c0_16, %c0_17] : memref<8x128xf32, #tpu.memory_space<vmem>>, vector<8x128xf32>
    tpu.vector_store %arg4[%c0_16, %c0_17], %40 {strides = array<i32>} : memref<8x128xf32, #tpu.memory_space<vmem>>, vector<8x128xf32>,
    return
  }
}

</mosaic_0001>

<bundles_post_ra>
// kernel: tpu_custom_call.1
= control target key start
LH: loop header
LB: loop body
LE: loop exit
PB: predicated region body
PF: predicated region fallthrough
CT: control target
= control target key end

     0   :  { %9 = vsyncpa [#allocation3], 0  ;;  %s4235_s0 = inlined_call_operand.hbm [shape: bf16[8,768], index: 0, kind: input, shape index: {}]   ;;  %s4236_s1 = inlined_call_operand.hbm [shape: bf16[1280,512], index: 1, kind: input, shape index: {}]   ;;  %s4237_s2 = inlined_call_operand.hbm [shape: f32[3,512], index: 2, kind: input, shape index: {}]   ;;  %s4238_s3 = inlined_call_operand.hbm [shape: bf16[512,128], index: 3, kind: input, shape index: {}]   ;;  %s4239_s4 = inlined_call_operand.hbm [shape: f32[8,128], index: 4, kind: output, shape index: {}]  }
   0x1   :  { %10 = vsyncpa [#allocation6], 0 }
   0x2   :  { %11 = vsyncpa [#allocation9], 0 }
   0x3   :  { %12 = vsyncpa [#allocation4], 0  ;;  %s4078_s15 = smov [#allocation5]   ;;  %s3960_s19 = scalar_lea.hbm %s4236_s1, 40960 }
   0x4   :  { %s28_s16 = sshll.u32 %s4078_s15, 4  ;;  %p3961_p0 = scmp.ne.s32.totalorder %s4236_s1, %s3960_s19  ;;  %s29_s16 = int_to_ptr.vmem [resolvable:$true] %s28_s16 }
   0x5   :  { %p3964_p1 = scmp.lt.u32.totalorder %s3960_s19, %s4236_s1 }
   0x7   :  { %p3966_p2 = pnand %p3964_p1, %p3961_p0 }
   0x9   :  { %3969 = shalt.err (!%p3966_p2)
}
   0xa   :  { %s3970_s24 = scalar_lea.vmem %s29_s16, 40960  ;;  %p3975_p4 = scmp.lt.s32.totalorder %s29_s16, %s29_s16 }
   0xb   :  { %p3971_p3 = scmp.ne.s32.totalorder %s29_s16, %s3970_s24  ;;  %p3976_p5 = scmp.lt.s32.totalorder %s3970_s24, %s3970_s24 }
   0xd   :  { %p3977_p6 = por %p3976_p5, %p3975_p4 }
   0xf   :  { %p3978_p7 = pnand %p3977_p6, %p3971_p3 }
  0x11   :  { %3981 = shalt.err (!%p3978_p7)
}
  0x12   :  { %s4079_s25 = smov 256   ;;  %s4080_s26 = smov 16  }
  0x13   :  { %34 = dma.hbm_to_vmem [thread:$0]  %s4236_s1, 40960, %s29_s16, [#allocation6], %s4079_s25, %s4079_s25, %s4080_s26  }
  0x14   :  { %s4081_s29 = smov [#allocation2]   ;;  %s4082_s5 = smov [#allocation7]  }
  0x15   :  { %s19_s30 = sshll.u32 %s4081_s29, 4  ;;  %s41_s6 = sshll.u32 %s4082_s5, 4  ;;  %s20_s30 = int_to_ptr.vmem [resolvable:$true] %s19_s30  ;;  %s42_s6 = int_to_ptr.vmem [resolvable:$true] %s41_s6 }
  0x16   :  { %s3982_s9 = scalar_lea.hbm %s4235_s0, 384 }
  0x17   :  { %p3983_p8 = scmp.ne.s32.totalorder %s4235_s0, %s3982_s9  ;;  %p3986_p9 = scmp.lt.u32.totalorder %s3982_s9, %s4235_s0 }
  0x19   :  { %p3988_p10 = pnand %p3986_p9, %p3983_p8 }
  0x1b   :  { %3991 = shalt.err (!%p3988_p10)
}
  0x1c   :  { %s3992_s1 = scalar_lea.vmem %s20_s30, 384  ;;  %p3997_p12 = scmp.lt.s32.totalorder %s20_s30, %s20_s30 }
  0x1d   :  { %p3993_p11 = scmp.ne.s32.totalorder %s20_s30, %s3992_s1  ;;  %p3998_p13 = scmp.lt.s32.totalorder %s3992_s1, %s3992_s1 }
  0x1f   :  { %p3999_p0 = por %p3998_p13, %p3997_p12 }
  0x21   :  { %p4000_p1 = pnand %p3999_p0, %p3993_p11 }
  0x23   :  { %4003 = shalt.err (!%p4000_p1)
}
  0x24   :  { %22 = dma.hbm_to_vmem [thread:$0]  %s4235_s0, 384, %s20_s30, [#allocation3]  }
  0x25   :  { %s4004_s18 = scalar_lea.hbm %s4237_s2, 256 }
  0x26   :  { %p4005_p2 = scmp.ne.s32.totalorder %s4237_s2, %s4004_s18  ;;  %p4008_p3 = scmp.lt.u32.totalorder %s4004_s18, %s4237_s2 }
  0x28   :  { %p4010_p4 = pnand %p4008_p3, %p4005_p2 }
  0x2a   :  { %4013 = shalt.err (!%p4010_p4)
}
  0x2b   :  { %s4014_s23 = scalar_lea.vmem %s42_s6, 256  ;;  %p4019_p6 = scmp.lt.s32.totalorder %s42_s6, %s42_s6 }
  0x2c   :  { %p4015_p5 = scmp.ne.s32.totalorder %s42_s6, %s4014_s23  ;;  %p4020_p7 = scmp.lt.s32.totalorder %s4014_s23, %s4014_s23 }
  0x2e   :  { %p4021_p8 = por %p4020_p7, %p4019_p6 }
  0x30   :  { %p4022_p9 = pnand %p4021_p8, %p4015_p5 }
  0x32   :  { %4025 = shalt.err (!%p4022_p9)
}
  0x33   :  { %44 = dma.hbm_to_vmem [thread:$0]  %s4237_s2, 256, %s42_s6, [#allocation6]  }
  0x34   :  { %s4083_s25 = smov [#allocation8]   ;;  %s4026_s29 = scalar_lea.hbm %s4238_s3, 4096 }
  0x35   :  { %s50_s26 = sshll.u32 %s4083_s25, 4  ;;  %p4027_p10 = scmp.ne.s32.totalorder %s4238_s3, %s4026_s29  ;;  %s51_s26 = int_to_ptr.vmem [resolvable:$true] %s50_s26 }
  0x36   :  { %p4030_p11 = scmp.lt.u32.totalorder %s4026_s29, %s4238_s3 }
  0x38   :  { %p4032_p12 = pnand %p4030_p11, %p4027_p10 }
  0x3a   :  { %4035 = shalt.err (!%p4032_p12)
}
  0x3b   :  { %s4036_s9 = scalar_lea.vmem %s51_s26, 4096  ;;  %p4041_p0 = scmp.lt.s32.totalorder %s51_s26, %s51_s26 }
  0x3c   :  { %p4037_p13 = scmp.ne.s32.totalorder %s51_s26, %s4036_s9  ;;  %p4042_p1 = scmp.lt.s32.totalorder %s4036_s9, %s4036_s9 }
  0x3e   :  { %p4043_p2 = por %p4042_p1, %p4041_p0 }
  0x40   :  { %p4044_p3 = pnand %p4043_p2, %p4037_p13 }
  0x42   :  { %4047 = shalt.err (!%p4044_p3)
}
  0x43   :  { %s4084_s2 = smov 64   ;;  %s4085_s6 = smov 4  }
  0x44   :  { %56 = dma.hbm_to_vmem [thread:$0]  %s4238_s3, 4096, %s51_s26, [#allocation9], %s4084_s2, %s4084_s2, %s4085_s6  }
  0x45   :  { %4070 = dma.done.wait [#allocation3], 384  }
  0x46   :  { %4071 = vsyncadd [#allocation3], 4294966912 }
  0x47   :  { %4072 = dma.done.wait [#allocation6], 41216  }
  0x48   :  { %4073 = vsyncadd [#allocation6], 4294926080 }
  0x49   :  { %4074 = dma.done.wait [#allocation9], 4096  }
  0x4a   :  { %4075 = vsyncadd [#allocation9], 4294963200  ;;  %v3418_v0 = vld [vmem:[#allocation5 + $0x4] ss:$16 sps:$4 sm:$0xff]   ;;  %v3420_v1 = vld [vmem:[#allocation5 + $0xc] ss:$16 sps:$4 sm:$0xff]  }
  0x4b   :  { %1414 = vmatprep.subr.bf16.mxu0 %v3418_v0  ;;  %v3422_v2 = vld [vmem:[#allocation5] ss:$16 sps:$4 sm:$0xff]   ;;  %v3423_v3 = vld [vmem:[#allocation5 + $0x8] ss:$16 sps:$4 sm:$0xff]   ;;  %1537 = vmatprep.subr.bf16.mxu1 %v3420_v1  ;;  %v3424_v4 = vld [vmem:[#allocation5 + $0x24] ss:$16 sps:$4 sm:$0xff]  }
  0x4c   :  { %1415 = vmatpush1.bf16.msra.mxu0 %v3422_v2  ;;  %1538 = vmatpush1.bf16.msra.mxu1 %v3423_v3  ;;  %v3426_v5 = vld [vmem:[#allocation5 + $0x2c] ss:$16 sps:$4 sm:$0xff]   ;;  %v3428_v6 = vld [vmem:[#allocation5 + $0x20] ss:$16 sps:$4 sm:$0xff]   ;;  %v3429_v7 = vld [vmem:[#allocation5 + $0x28] ss:$16 sps:$4 sm:$0xff]  }
  0x4d   :  { %1416 = vmatprep.subr.bf16.mxu0 %v3424_v4  ;;  %1539 = vmatprep.subr.bf16.mxu1 %v3426_v5  ;;  %v3430_v8 = vld [vmem:[#allocation5 + $0x44] ss:$16 sps:$4 sm:$0xff]   ;;  %v3432_v9 = vld [vmem:[#allocation5 + $0x4c] ss:$16 sps:$4 sm:$0xff]   ;;  %v3434_v10 = vld [vmem:[#allocation5 + $0x40] ss:$16 sps:$4 sm:$0xff]  }
  0x4e   :  { %v3435_v11 = vld [vmem:[#allocation5 + $0x48] ss:$16 sps:$4 sm:$0xff]   ;;  %v3436_v12 = vld [vmem:[#allocation5 + $0x64] ss:$16 sps:$4 sm:$0xff]   ;;  %v3438_v13 = vld [vmem:[#allocation5 + $0x6c] ss:$16 sps:$4 sm:$0xff]  }
  0x4f   :  { %v3440_v14 = vld [vmem:[#allocation5 + $0x60] ss:$16 sps:$4 sm:$0xff]   ;;  %v3441_v15 = vld [vmem:[#allocation5 + $0x68] ss:$16 sps:$4 sm:$0xff]   ;;  %v3442_v16 = vld [vmem:[#allocation5 + $0x84] ss:$16 sps:$4 sm:$0xff]  }
  0x50   :  { %1417 = vmatpush1.bf16.msra.mxu0 %v3428_v6  ;;  %1540 = vmatpush1.bf16.msra.mxu1 %v3429_v7  ;;  %v3444_v17 = vld [vmem:[#allocation5 + $0x8c] ss:$16 sps:$4 sm:$0xff]   ;;  %v3446_v18 = vld [vmem:[#allocation5 + $0x80] ss:$16 sps:$4 sm:$0xff]   ;;  %v3447_v19 = vld [vmem:[#allocation5 + $0x88] ss:$16 sps:$4 sm:$0xff]  }
  0x51   :  { %1418 = vmatprep.subr.bf16.mxu0 %v3430_v8  ;;  %1541 = vmatprep.subr.bf16.mxu1 %v3432_v9  ;;  %v3448_v20 = vld [vmem:[#allocation5 + $0xa4] ss:$16 sps:$4 sm:$0xff]   ;;  %v3450_v21 = vld [vmem:[#allocation5 + $0xac] ss:$16 sps:$4 sm:$0xff]   ;;  %v3452_v22 = vld [vmem:[#allocation5 + $0xa0] ss:$16 sps:$4 sm:$0xff]  }
  0x52   :  { %v3453_v23 = vld [vmem:[#allocation5 + $0xa8] ss:$16 sps:$4 sm:$0xff]   ;;  %v3454_v24 = vld [vmem:[#allocation5 + $0xc4] ss:$16 sps:$4 sm:$0xff]   ;;  %v3456_v25 = vld [vmem:[#allocation5 + $0xcc] ss:$16 sps:$4 sm:$0xff]  }
  0x53   :  { %v3458_v26 = vld [vmem:[#allocation5 + $0xc0] ss:$16 sps:$4 sm:$0xff]   ;;  %v3459_v27 = vld [vmem:[#allocation5 + $0xc8] ss:$16 sps:$4 sm:$0xff]   ;;  %v3460_v28 = vld [vmem:[#allocation5 + $0xe4] ss:$16 sps:$4 sm:$0xff]  }
  0x54   :  { %1419 = vmatpush1.bf16.msra.mxu0 %v3434_v10  ;;  %1542 = vmatpush1.bf16.msra.mxu1 %v3435_v11  ;;  %v3462_v29 = vld [vmem:[#allocation5 + $0xec] ss:$16 sps:$4 sm:$0xff]   ;;  %v3464_v30 = vld [vmem:[#allocation5 + $0xe0] ss:$16 sps:$4 sm:$0xff]   ;;  %v3465_v31 = vld [vmem:[#allocation5 + $0xe8] ss:$16 sps:$4 sm:$0xff]  }
  0x55   :  { %1420 = vmatprep.subr.bf16.mxu0 %v3436_v12  ;;  %1543 = vmatprep.subr.bf16.mxu1 %v3438_v13  ;;  %v3466_v32 = vld [vmem:[#allocation5 + $0x104] ss:$16 sps:$4 sm:$0xff]   ;;  %v3468_v33 = vld [vmem:[#allocation5 + $0x10c] ss:$16 sps:$4 sm:$0xff]   ;;  %v3470_v34 = vld [vmem:[#allocation5 + $0x100] ss:$16 sps:$4 sm:$0xff]  }
  0x56   :  { %v3471_v35 = vld [vmem:[#allocation5 + $0x108] ss:$16 sps:$4 sm:$0xff]   ;;  %v3472_v36 = vld [vmem:[#allocation5 + $0x124] ss:$16 sps:$4 sm:$0xff]   ;;  %v3474_v37 = vld [vmem:[#allocation5 + $0x12c] ss:$16 sps:$4 sm:$0xff]  }
  0x57   :  { %v3476_v38 = vld [vmem:[#allocation5 + $0x120] ss:$16 sps:$4 sm:$0xff]   ;;  %v3477_v39 = vld [vmem:[#allocation5 + $0x128] ss:$16 sps:$4 sm:$0xff]   ;;  %v3478_v40 = vld [vmem:[#allocation5 + $0x144] ss:$16 sps:$4 sm:$0xff]  }
  0x58   :  { %1421 = vmatpush1.bf16.msra.mxu0 %v3440_v14  ;;  %1544 = vmatpush1.bf16.msra.mxu1 %v3441_v15  ;;  %v3480_v41 = vld [vmem:[#allocation5 + $0x14c] ss:$16 sps:$4 sm:$0xff]   ;;  %v3482_v42 = vld [vmem:[#allocation5 + $0x140] ss:$16 sps:$4 sm:$0xff]   ;;  %v3483_v43 = vld [vmem:[#allocation5 + $0x148] ss:$16 sps:$4 sm:$0xff]  }
  0x59   :  { %1422 = vmatprep.subr.bf16.mxu0 %v3442_v16  ;;  %1545 = vmatprep.subr.bf16.mxu1 %v3444_v17  ;;  %v3484_v44 = vld [vmem:[#allocation5 + $0x164] ss:$16 sps:$4 sm:$0xff]   ;;  %v3486_v45 = vld [vmem:[#allocation5 + $0x16c] ss:$16 sps:$4 sm:$0xff]   ;;  %v3488_v47 = vld [vmem:[#allocation5 + $0x160] ss:$16 sps:$4 sm:$0xff]  }
  0x5a   :  { %v392_v46 = vld [vmem:[#allocation2] sm:$0xff]  ;;  %v3490_v50 = vld [vmem:[#allocation5 + $0x184] ss:$16 sps:$4 sm:$0xff]   ;;  %v3494_v52 = vld [vmem:[#allocation5 + $0x180] ss:$16 sps:$4 sm:$0xff]   ;;  %s4086_s3 = smov [#allocation10]  }
  0x5b   :  { %v2972_v48 = vcombine.high %v392_v46, %v392_v46  ;;  %v3489_v49 = vld [vmem:[#allocation5 + $0x168] ss:$16 sps:$4 sm:$0xff]   ;;  %v3492_v51 = vld [vmem:[#allocation5 + $0x18c] ss:$16 sps:$4 sm:$0xff]   ;;  %v3496_v54 = vld [vmem:[#allocation5 + $0x1a4] ss:$16 sps:$4 sm:$0xff]   ;;  %v2971_v4 = vcombine.low %v392_v46, %v392_v46 }
  0x5c   :  { %1423 = vmatpush1.bf16.msra.mxu0 %v3446_v18  ;;  %1546 = vmatpush1.bf16.msra.mxu1 %v3447_v19  ;;  %v3495_v53 = vld [vmem:[#allocation5 + $0x188] ss:$16 sps:$4 sm:$0xff]   ;;  %v3498_v55 = vld [vmem:[#allocation5 + $0x1ac] ss:$16 sps:$4 sm:$0xff]   ;;  %v3500_v56 = vld [vmem:[#allocation5 + $0x1a0] ss:$16 sps:$4 sm:$0xff]  }
  0x5d   :  { %1424 = vmatprep.subr.bf16.mxu0 %v3448_v20  ;;  %1547 = vmatprep.subr.bf16.mxu1 %v3450_v21  ;;  %v3501_v57 = vld [vmem:[#allocation5 + $0x1a8] ss:$16 sps:$4 sm:$0xff]   ;;  %v3502_v58 = vld [vmem:[#allocation5 + $0x1c4] ss:$16 sps:$4 sm:$0xff]   ;;  %v3504_v59 = vld [vmem:[#allocation5 + $0x1cc] ss:$16 sps:$4 sm:$0xff]  }
  0x5e   :  { %1446 = vmatprep.mubr.bf16.mxu0 %v2972_v48  ;;  %1569 = vmatprep.mubr.bf16.mxu1 %v2972_v48  ;;  %v3506_v60 = vld [vmem:[#allocation5 + $0x1c0] ss:$16 sps:$4 sm:$0xff]   ;;  %v3507_v61 = vld [vmem:[#allocation5 + $0x1c8] ss:$16 sps:$4 sm:$0xff]   ;;  %v3508_v62 = vld [vmem:[#allocation5 + $0x1e4] ss:$16 sps:$4 sm:$0xff]  }
  0x5f   :  { %v3510_v63 = vld [vmem:[#allocation5 + $0x1ec] ss:$16 sps:$4 sm:$0xff]   ;;  %v3512_v0 = vld [vmem:[#allocation5 + $0x1e0] ss:$16 sps:$4 sm:$0xff]   ;;  %v3513_v1 = vld [vmem:[#allocation5 + $0x1e8] ss:$16 sps:$4 sm:$0xff]  }
  0x60   :  { %1425 = vmatpush1.bf16.msra.mxu0 %v3452_v22  ;;  %1548 = vmatpush1.bf16.msra.mxu1 %v3453_v23  ;;  %v3518_v2 = vld [vmem:[#allocation5 + $0x204] ss:$16 sps:$4 sm:$0xff]   ;;  %v3521_v3 = vld [vmem:[#allocation5 + $0x20c] ss:$16 sps:$4 sm:$0xff]   ;;  %v3516_v5 = vld [vmem:[#allocation5 + $0x200] ss:$16 sps:$4 sm:$0xff]  }
  0x61   :  { %1426 = vmatprep.subr.bf16.mxu0 %v3454_v24  ;;  %1549 = vmatprep.subr.bf16.mxu1 %v3456_v25  ;;  %v3519_v6 = vld [vmem:[#allocation5 + $0x208] ss:$16 sps:$4 sm:$0xff]   ;;  %v3524_v7 = vld [vmem:[#allocation5 + $0x224] ss:$16 sps:$4 sm:$0xff]   ;;  %v3527_v8 = vld [vmem:[#allocation5 + $0x22c] ss:$16 sps:$4 sm:$0xff]  }
  0x62   :  { %v3522_v9 = vld [vmem:[#allocation5 + $0x220] ss:$16 sps:$4 sm:$0xff]   ;;  %v3525_v10 = vld [vmem:[#allocation5 + $0x228] ss:$16 sps:$4 sm:$0xff]   ;;  %v3530_v11 = vld [vmem:[#allocation5 + $0x244] ss:$16 sps:$4 sm:$0xff]  }
  0x63   :  { %v3533_v12 = vld [vmem:[#allocation5 + $0x24c] ss:$16 sps:$4 sm:$0xff]   ;;  %v3528_v13 = vld [vmem:[#allocation5 + $0x240] ss:$16 sps:$4 sm:$0xff]   ;;  %v3531_v14 = vld [vmem:[#allocation5 + $0x248] ss:$16 sps:$4 sm:$0xff]  }
  0x64   :  { %1427 = vmatpush1.bf16.msra.mxu0 %v3458_v26  ;;  %1550 = vmatpush1.bf16.msra.mxu1 %v3459_v27  ;;  %v3536_v15 = vld [vmem:[#allocation5 + $0x264] ss:$16 sps:$4 sm:$0xff]   ;;  %v3539_v16 = vld [vmem:[#allocation5 + $0x26c] ss:$16 sps:$4 sm:$0xff]   ;;  %v3534_v17 = vld [vmem:[#allocation5 + $0x260] ss:$16 sps:$4 sm:$0xff]  }
  0x65   :  { %1428 = vmatprep.subr.bf16.mxu0 %v3460_v28  ;;  %1551 = vmatprep.subr.bf16.mxu1 %v3462_v29  ;;  %v3537_v18 = vld [vmem:[#allocation5 + $0x268] ss:$16 sps:$4 sm:$0xff]   ;;  %v3542_v19 = vld [vmem:[#allocation5 + $0x284] ss:$16 sps:$4 sm:$0xff]   ;;  %v3545_v20 = vld [vmem:[#allocation5 + $0x28c] ss:$16 sps:$4 sm:$0xff]  }
  0x66   :  { %v3540_v21 = vld [vmem:[#allocation5 + $0x280] ss:$16 sps:$4 sm:$0xff]   ;;  %v3543_v22 = vld [vmem:[#allocation5 + $0x288] ss:$16 sps:$4 sm:$0xff]   ;;  %v3548_v23 = vld [vmem:[#allocation5 + $0x2a4] ss:$16 sps:$4 sm:$0xff]  }
  0x67   :  { %v3551_v24 = vld [vmem:[#allocation5 + $0x2ac] ss:$16 sps:$4 sm:$0xff]   ;;  %v3546_v25 = vld [vmem:[#allocation5 + $0x2a0] ss:$16 sps:$4 sm:$0xff]   ;;  %v3549_v26 = vld [vmem:[#allocation5 + $0x2a8] ss:$16 sps:$4 sm:$0xff]  }
  0x68   :  { %1429 = vmatpush1.bf16.msra.mxu0 %v3464_v30  ;;  %1552 = vmatpush1.bf16.msra.mxu1 %v3465_v31  ;;  %v3554_v27 = vld [vmem:[#allocation5 + $0x2c4] ss:$16 sps:$4 sm:$0xff]   ;;  %v3557_v28 = vld [vmem:[#allocation5 + $0x2cc] ss:$16 sps:$4 sm:$0xff]   ;;  %v3552_v31 = vld [vmem:[#allocation5 + $0x2c0] ss:$16 sps:$4 sm:$0xff]  }
  0x69   :  { %1430 = vmatprep.subr.bf16.mxu0 %v3466_v32  ;;  %1553 = vmatprep.subr.bf16.mxu1 %v3468_v33  ;;  %v4160_v29 = vld [vmem:[#allocation2 + $0x8] sm:$0xff]  ;;  %v3555_v32 = vld [vmem:[#allocation5 + $0x2c8] ss:$16 sps:$4 sm:$0xff]   ;;  %v3581_v46 = vld [vmem:[#allocation5 + $0x34c] ss:$16 sps:$4 sm:$0xff]   ;;  %s2960_s12 = sshll.u32 %s4086_s3, 4  ;;  %s2961_s12 = int_to_ptr.vmem [resolvable:$true] %s2960_s12 }
  0x6a   :  { %v2974_v30 = vcombine.high %v4160_v29, %v4160_v29  ;;  %v3560_v33 = vld [vmem:[#allocation5 + $0x2e4] ss:$16 sps:$4 sm:$0xff]   ;;  %v3579_v48 = vld [vmem:[#allocation5 + $0x348] ss:$16 sps:$4 sm:$0xff]   ;;  %s4048_s13 = scalar_lea.vmem %s2961_s12, 128  ;;  %p4053_p5 = scmp.lt.s32.totalorder %s2961_s12, %s2961_s12 }
  0x6b   :  { %p4049_p4 = scmp.ne.s32.totalorder %s2961_s12, %s4048_s13  ;;  %p4054_p6 = scmp.lt.s32.totalorder %s4048_s13, %s4048_s13 }
  0x6c   :  { %1431 = vmatpush1.bf16.msra.mxu0 %v3470_v34  ;;  %1554 = vmatpush1.bf16.msra.mxu1 %v3471_v35  ;;  %v3563_v34 = vld [vmem:[#allocation5 + $0x2ec] ss:$16 sps:$4 sm:$0xff]   ;;  %v3558_v35 = vld [vmem:[#allocation5 + $0x2e0] ss:$16 sps:$4 sm:$0xff]  }
  0x6d   :  { %1432 = vmatprep.subr.bf16.mxu0 %v3472_v36  ;;  %1555 = vmatprep.subr.bf16.mxu1 %v3474_v37  ;;  %v3561_v36 = vld [vmem:[#allocation5 + $0x2e8] ss:$16 sps:$4 sm:$0xff]   ;;  %v3566_v37 = vld [vmem:[#allocation5 + $0x304] ss:$16 sps:$4 sm:$0xff]   ;;  %p4055_p7 = por %p4054_p6, %p4053_p5 }
  0x6f   :  { %p4056_p8 = pnand %p4055_p7, %p4049_p4 }
  0x70   :  { %1433 = vmatpush1.bf16.msra.mxu0 %v3476_v38  ;;  %1556 = vmatpush1.bf16.msra.mxu1 %v3477_v39  ;;  %v3569_v38 = vld [vmem:[#allocation5 + $0x30c] ss:$16 sps:$4 sm:$0xff]   ;;  %v3564_v39 = vld [vmem:[#allocation5 + $0x300] ss:$16 sps:$4 sm:$0xff]  }
  0x71   :  { %1434 = vmatprep.subr.bf16.mxu0 %v3478_v40  ;;  %1557 = vmatprep.subr.bf16.mxu1 %v3480_v41  ;;  %v3567_v40 = vld [vmem:[#allocation5 + $0x308] ss:$16 sps:$4 sm:$0xff]   ;;  %v3572_v41 = vld [vmem:[#allocation5 + $0x324] ss:$16 sps:$4 sm:$0xff]  }
  0x74   :  { %1435 = vmatpush1.bf16.msra.mxu0 %v3482_v42  ;;  %1558 = vmatpush1.bf16.msra.mxu1 %v3483_v43  ;;  %v3575_v42 = vld [vmem:[#allocation5 + $0x32c] ss:$16 sps:$4 sm:$0xff]   ;;  %v3570_v43 = vld [vmem:[#allocation5 + $0x320] ss:$16 sps:$4 sm:$0xff]  }
  0x75   :  { %1436 = vmatprep.subr.bf16.mxu0 %v3484_v44  ;;  %1559 = vmatprep.subr.bf16.mxu1 %v3486_v45  ;;  %v3573_v44 = vld [vmem:[#allocation5 + $0x328] ss:$16 sps:$4 sm:$0xff]   ;;  %v3578_v45 = vld [vmem:[#allocation5 + $0x344] ss:$16 sps:$4 sm:$0xff]  }
  0x78   :  { %1437 = vmatpush1.bf16.msra.mxu0 %v3488_v47  ;;  %1560 = vmatpush1.bf16.msra.mxu1 %v3489_v49  ;;  %v3576_v47 = vld [vmem:[#allocation5 + $0x340] ss:$16 sps:$4 sm:$0xff]   ;;  %v3584_v49 = vld [vmem:[#allocation5 + $0x364] ss:$16 sps:$4 sm:$0xff]  }
  0x79   :  { %1438 = vmatprep.subr.bf16.mxu0 %v3490_v50  ;;  %1561 = vmatprep.subr.bf16.mxu1 %v3492_v51  ;;  %v3587_v50 = vld [vmem:[#allocation5 + $0x36c] ss:$16 sps:$4 sm:$0xff]   ;;  %v3582_v51 = vld [vmem:[#allocation5 + $0x360] ss:$16 sps:$4 sm:$0xff]  }
  0x7c   :  { %1439 = vmatpush1.bf16.msra.mxu0 %v3494_v52  ;;  %1562 = vmatpush1.bf16.msra.mxu1 %v3495_v53  ;;  %v3585_v52 = vld [vmem:[#allocation5 + $0x368] ss:$16 sps:$4 sm:$0xff]   ;;  %v3590_v53 = vld [vmem:[#allocation5 + $0x384] ss:$16 sps:$4 sm:$0xff]  }
  0x7d   :  { %1440 = vmatprep.subr.bf16.mxu0 %v3496_v54  ;;  %1563 = vmatprep.subr.bf16.mxu1 %v3498_v55  ;;  %v3593_v54 = vld [vmem:[#allocation5 + $0x38c] ss:$16 sps:$4 sm:$0xff]   ;;  %v3588_v55 = vld [vmem:[#allocation5 + $0x380] ss:$16 sps:$4 sm:$0xff]  }
  0x80   :  { %1441 = vmatpush1.bf16.msra.mxu0 %v3500_v56  ;;  %1564 = vmatpush1.bf16.msra.mxu1 %v3501_v57  ;;  %v3591_v56 = vld [vmem:[#allocation5 + $0x388] ss:$16 sps:$4 sm:$0xff]   ;;  %v3596_v57 = vld [vmem:[#allocation5 + $0x3a4] ss:$16 sps:$4 sm:$0xff]  }
  0x81   :  { %1442 = vmatprep.subr.bf16.mxu0 %v3502_v58  ;;  %1565 = vmatprep.subr.bf16.mxu1 %v3504_v59  ;;  %v3599_v58 = vld [vmem:[#allocation5 + $0x3ac] ss:$16 sps:$4 sm:$0xff]   ;;  %v3594_v59 = vld [vmem:[#allocation5 + $0x3a0] ss:$16 sps:$4 sm:$0xff]  }
  0x84   :  { %1443 = vmatpush1.bf16.msra.mxu0 %v3506_v60  ;;  %1566 = vmatpush1.bf16.msra.mxu1 %v3507_v61  ;;  %v3597_v60 = vld [vmem:[#allocation5 + $0x3a8] ss:$16 sps:$4 sm:$0xff]   ;;  %v3602_v61 = vld [vmem:[#allocation5 + $0x3c4] ss:$16 sps:$4 sm:$0xff]  }
  0x85   :  { %1444 = vmatprep.subr.bf16.mxu0 %v3508_v62  ;;  %1567 = vmatprep.subr.bf16.mxu1 %v3510_v63  ;;  %v3605_v62 = vld [vmem:[#allocation5 + $0x3cc] ss:$16 sps:$4 sm:$0xff]   ;;  %v3600_v63 = vld [vmem:[#allocation5 + $0x3c0] ss:$16 sps:$4 sm:$0xff]  }
  0x88   :  { %1445 = vmatpush1.bf16.msra.mxu0 %v3512_v0  ;;  %1568 = vmatpush1.bf16.msra.mxu1 %v3513_v1  ;;  %v3603_v0 = vld [vmem:[#allocation5 + $0x3c8] ss:$16 sps:$4 sm:$0xff]   ;;  %v3608_v1 = vld [vmem:[#allocation5 + $0x3e4] ss:$16 sps:$4 sm:$0xff]  }
  0x89   :  { %1455 = vmatprep.subr.bf16.mxu0 %v3518_v2  ;;  %1578 = vmatprep.subr.bf16.mxu1 %v3521_v3  ;;  %v3611_v2 = vld [vmem:[#allocation5 + $0x3ec] ss:$16 sps:$4 sm:$0xff]   ;;  %v3606_v3 = vld [vmem:[#allocation5 + $0x3e0] ss:$16 sps:$4 sm:$0xff]  }
  0x8b   :  { %1447 = vmatmul.mubr.bf16.vlgmr.msra.gmra.mrb[0].mxu0 %v2971_v4  ;;  %1570 = vmatmul.mubr.bf16.vlgmr.msra.gmra.mrb[0].mxu1 %v2971_v4  ;;  %v3609_v4 = vld [vmem:[#allocation5 + $0x3e8] ss:$16 sps:$4 sm:$0xff]  }
  0x8c   :  { %1456 = vmatpush1.bf16.msra.mxu0 %v3516_v5  ;;  %1579 = vmatpush1.bf16.msra.mxu1 %v3519_v6  ;;  %v3616_v5 = vld [vmem:[#allocation5 + $0x404] ss:$16 sps:$4 sm:$0xff]   ;;  %v3619_v6 = vld [vmem:[#allocation5 + $0x40c] ss:$16 sps:$4 sm:$0xff]  }
  0x8d   :  { %1457 = vmatprep.subr.bf16.mxu0 %v3524_v7  ;;  %1580 = vmatprep.subr.bf16.mxu1 %v3527_v8  ;;  %v2973_v7 = vcombine.low %v4160_v29, %v4160_v29  ;;  %v3614_v8 = vld [vmem:[#allocation5 + $0x400] ss:$16 sps:$4 sm:$0xff]   ;;  %v3649_v29 = vld [vmem:[#allocation5 + $0x4ac] ss:$16 sps:$4 sm:$0xff]  }
  0x8e   :  { %1487 = vmatprep.mubr.bf16.mxu0 %v2974_v30  ;;  %1610 = vmatprep.mubr.bf16.mxu1 %v2974_v30  ;;  %v3644_v30 = vld [vmem:[#allocation5 + $0x4a0] ss:$16 sps:$4 sm:$0xff]  }
  0x90   :  { %1458 = vmatpush1.bf16.msra.mxu0 %v3522_v9  ;;  %1581 = vmatpush1.bf16.msra.mxu1 %v3525_v10  ;;  %v3617_v9 = vld [vmem:[#allocation5 + $0x408] ss:$16 sps:$4 sm:$0xff]   ;;  %v3622_v10 = vld [vmem:[#allocation5 + $0x424] ss:$16 sps:$4 sm:$0xff]  }
  0x91   :  { %1459 = vmatprep.subr.bf16.mxu0 %v3530_v11  ;;  %1582 = vmatprep.subr.bf16.mxu1 %v3533_v12  ;;  %v4166_v11 = vld [vmem:[#allocation2 + $0x10] sm:$0xff] }
  0x92   :  { %v3625_v12 = vld [vmem:[#allocation5 + $0x42c] ss:$16 sps:$4 sm:$0xff]  }
  0x94   :  { %1460 = vmatpush1.bf16.msra.mxu0 %v3528_v13  ;;  %1583 = vmatpush1.bf16.msra.mxu1 %v3531_v14  ;;  %v2976_v13 = vcombine.high %v4166_v11, %v4166_v11  ;;  %v3620_v14 = vld [vmem:[#allocation5 + $0x420] ss:$16 sps:$4 sm:$0xff]  }
  0x95   :  { %1461 = vmatprep.subr.bf16.mxu0 %v3536_v15  ;;  %1584 = vmatprep.subr.bf16.mxu1 %v3539_v16  ;;  %v3623_v15 = vld [vmem:[#allocation5 + $0x428] ss:$16 sps:$4 sm:$0xff]   ;;  %v3628_v16 = vld [vmem:[#allocation5 + $0x444] ss:$16 sps:$4 sm:$0xff]  }
  0x98   :  { %1462 = vmatpush1.bf16.msra.mxu0 %v3534_v17  ;;  %1585 = vmatpush1.bf16.msra.mxu1 %v3537_v18  ;;  %v3631_v17 = vld [vmem:[#allocation5 + $0x44c] ss:$16 sps:$4 sm:$0xff]   ;;  %v3626_v18 = vld [vmem:[#allocation5 + $0x440] ss:$16 sps:$4 sm:$0xff]  }
  0x99   :  { %1463 = vmatprep.subr.bf16.mxu0 %v3542_v19  ;;  %1586 = vmatprep.subr.bf16.mxu1 %v3545_v20  ;;  %v3629_v19 = vld [vmem:[#allocation5 + $0x448] ss:$16 sps:$4 sm:$0xff]   ;;  %v3634_v20 = vld [vmem:[#allocation5 + $0x464] ss:$16 sps:$4 sm:$0xff]  }
  0x9c   :  { %1464 = vmatpush1.bf16.msra.mxu0 %v3540_v21  ;;  %1587 = vmatpush1.bf16.msra.mxu1 %v3543_v22  ;;  %v3637_v21 = vld [vmem:[#allocation5 + $0x46c] ss:$16 sps:$4 sm:$0xff]   ;;  %v3632_v22 = vld [vmem:[#allocation5 + $0x460] ss:$16 sps:$4 sm:$0xff]  }
  0x9d   :  { %1465 = vmatprep.subr.bf16.mxu0 %v3548_v23  ;;  %1588 = vmatprep.subr.bf16.mxu1 %v3551_v24  ;;  %v3635_v23 = vld [vmem:[#allocation5 + $0x468] ss:$16 sps:$4 sm:$0xff]   ;;  %v3640_v24 = vld [vmem:[#allocation5 + $0x484] ss:$16 sps:$4 sm:$0xff]  }
  0xa0   :  { %1466 = vmatpush1.bf16.msra.mxu0 %v3546_v25  ;;  %1589 = vmatpush1.bf16.msra.mxu1 %v3549_v26  ;;  %v3643_v25 = vld [vmem:[#allocation5 + $0x48c] ss:$16 sps:$4 sm:$0xff]   ;;  %v3638_v26 = vld [vmem:[#allocation5 + $0x480] ss:$16 sps:$4 sm:$0xff]  }
  0xa1   :  { %1467 = vmatprep.subr.bf16.mxu0 %v3554_v27  ;;  %1590 = vmatprep.subr.bf16.mxu1 %v3557_v28  ;;  %v3641_v27 = vld [vmem:[#allocation5 + $0x488] ss:$16 sps:$4 sm:$0xff]   ;;  %v3646_v28 = vld [vmem:[#allocation5 + $0x4a4] ss:$16 sps:$4 sm:$0xff]  }
  0xa4   :  { %1468 = vmatpush1.bf16.msra.mxu0 %v3552_v31  ;;  %1591 = vmatpush1.bf16.msra.mxu1 %v3555_v32  ;;  %v3647_v31 = vld [vmem:[#allocation5 + $0x4a8] ss:$16 sps:$4 sm:$0xff]   ;;  %v3652_v32 = vld [vmem:[#allocation5 + $0x4c4] ss:$16 sps:$4 sm:$0xff]  }
  0xa5   :  { %1469 = vmatprep.subr.bf16.mxu0 %v3560_v33  ;;  %1592 = vmatprep.subr.bf16.mxu1 %v3563_v34  ;;  %v3655_v33 = vld [vmem:[#allocation5 + $0x4cc] ss:$16 sps:$4 sm:$0xff]   ;;  %v3650_v34 = vld [vmem:[#allocation5 + $0x4c0] ss:$16 sps:$4 sm:$0xff]  }
  0xa8   :  { %1470 = vmatpush1.bf16.msra.mxu0 %v3558_v35  ;;  %1593 = vmatpush1.bf16.msra.mxu1 %v3561_v36  ;;  %v3653_v35 = vld [vmem:[#allocation5 + $0x4c8] ss:$16 sps:$4 sm:$0xff]   ;;  %v3658_v36 = vld [vmem:[#allocation5 + $0x4e4] ss:$16 sps:$4 sm:$0xff]  }
  0xa9   :  { %1471 = vmatprep.subr.bf16.mxu0 %v3566_v37  ;;  %1594 = vmatprep.subr.bf16.mxu1 %v3569_v38  ;;  %v3661_v37 = vld [vmem:[#allocation5 + $0x4ec] ss:$16 sps:$4 sm:$0xff]   ;;  %v3656_v38 = vld [vmem:[#allocation5 + $0x4e0] ss:$16 sps:$4 sm:$0xff]  }
  0xac   :  { %1472 = vmatpush1.bf16.msra.mxu0 %v3564_v39  ;;  %1595 = vmatpush1.bf16.msra.mxu1 %v3567_v40  ;;  %v3659_v39 = vld [vmem:[#allocation5 + $0x4e8] ss:$16 sps:$4 sm:$0xff]   ;;  %v3664_v40 = vld [vmem:[#allocation5 + $0x504] ss:$16 sps:$4 sm:$0xff]  }
  0xad   :  { %1473 = vmatprep.subr.bf16.mxu0 %v3572_v41  ;;  %1596 = vmatprep.subr.bf16.mxu1 %v3575_v42  ;;  %v3667_v41 = vld [vmem:[#allocation5 + $0x50c] ss:$16 sps:$4 sm:$0xff]   ;;  %v3662_v42 = vld [vmem:[#allocation5 + $0x500] ss:$16 sps:$4 sm:$0xff]  }
  0xb0   :  { %1474 = vmatpush1.bf16.msra.mxu0 %v3570_v43  ;;  %1597 = vmatpush1.bf16.msra.mxu1 %v3573_v44  ;;  %v3665_v43 = vld [vmem:[#allocation5 + $0x508] ss:$16 sps:$4 sm:$0xff]   ;;  %v3670_v44 = vld [vmem:[#allocation5 + $0x524] ss:$16 sps:$4 sm:$0xff]  }
  0xb1   :  { %1475 = vmatprep.subr.bf16.mxu0 %v3578_v45  ;;  %1598 = vmatprep.subr.bf16.mxu1 %v3581_v46  ;;  %v3673_v45 = vld [vmem:[#allocation5 + $0x52c] ss:$16 sps:$4 sm:$0xff]   ;;  %v3668_v46 = vld [vmem:[#allocation5 + $0x520] ss:$16 sps:$4 sm:$0xff]  }
  0xb4   :  { %1476 = vmatpush1.bf16.msra.mxu0 %v3576_v47  ;;  %1599 = vmatpush1.bf16.msra.mxu1 %v3579_v48  ;;  %v3671_v47 = vld [vmem:[#allocation5 + $0x528] ss:$16 sps:$4 sm:$0xff]   ;;  %v3676_v48 = vld [vmem:[#allocation5 + $0x544] ss:$16 sps:$4 sm:$0xff]  }
  0xb5   :  { %1477 = vmatprep.subr.bf16.mxu0 %v3584_v49  ;;  %1600 = vmatprep.subr.bf16.mxu1 %v3587_v50  ;;  %v3679_v49 = vld [vmem:[#allocation5 + $0x54c] ss:$16 sps:$4 sm:$0xff]   ;;  %v3674_v50 = vld [vmem:[#allocation5 + $0x540] ss:$16 sps:$4 sm:$0xff]  }
  0xb8   :  { %1478 = vmatpush1.bf16.msra.mxu0 %v3582_v51  ;;  %1601 = vmatpush1.bf16.msra.mxu1 %v3585_v52  ;;  %v3677_v51 = vld [vmem:[#allocation5 + $0x548] ss:$16 sps:$4 sm:$0xff]   ;;  %v3682_v52 = vld [vmem:[#allocation5 + $0x564] ss:$16 sps:$4 sm:$0xff]  }
  0xb9   :  { %1479 = vmatprep.subr.bf16.mxu0 %v3590_v53  ;;  %1602 = vmatprep.subr.bf16.mxu1 %v3593_v54  ;;  %v3685_v53 = vld [vmem:[#allocation5 + $0x56c] ss:$16 sps:$4 sm:$0xff]   ;;  %v3680_v54 = vld [vmem:[#allocation5 + $0x560] ss:$16 sps:$4 sm:$0xff]  }
  0xbc   :  { %1480 = vmatpush1.bf16.msra.mxu0 %v3588_v55  ;;  %1603 = vmatpush1.bf16.msra.mxu1 %v3591_v56  ;;  %v3683_v55 = vld [vmem:[#allocation5 + $0x568] ss:$16 sps:$4 sm:$0xff]   ;;  %v3688_v56 = vld [vmem:[#allocation5 + $0x584] ss:$16 sps:$4 sm:$0xff]  }
  0xbd   :  { %1481 = vmatprep.subr.bf16.mxu0 %v3596_v57  ;;  %1604 = vmatprep.subr.bf16.mxu1 %v3599_v58  ;;  %v3691_v57 = vld [vmem:[#allocation5 + $0x58c] ss:$16 sps:$4 sm:$0xff]   ;;  %v3686_v58 = vld [vmem:[#allocation5 + $0x580] ss:$16 sps:$4 sm:$0xff]  }
  0xc0   :  { %1482 = vmatpush1.bf16.msra.mxu0 %v3594_v59  ;;  %1605 = vmatpush1.bf16.msra.mxu1 %v3597_v60  ;;  %v3689_v59 = vld [vmem:[#allocation5 + $0x588] ss:$16 sps:$4 sm:$0xff]   ;;  %v3694_v60 = vld [vmem:[#allocation5 + $0x5a4] ss:$16 sps:$4 sm:$0xff]  }
  0xc1   :  { %1483 = vmatprep.subr.bf16.mxu0 %v3602_v61  ;;  %1606 = vmatprep.subr.bf16.mxu1 %v3605_v62  ;;  %v3697_v61 = vld [vmem:[#allocation5 + $0x5ac] ss:$16 sps:$4 sm:$0xff]   ;;  %v3692_v62 = vld [vmem:[#allocation5 + $0x5a0] ss:$16 sps:$4 sm:$0xff]  }
  0xc4   :  { %1484 = vmatpush1.bf16.msra.mxu0 %v3600_v63  ;;  %1607 = vmatpush1.bf16.msra.mxu1 %v3603_v0  ;;  %v3695_v63 = vld [vmem:[#allocation5 + $0x5a8] ss:$16 sps:$4 sm:$0xff]   ;;  %v3700_v0 = vld [vmem:[#allocation5 + $0x5c4] ss:$16 sps:$4 sm:$0xff]  }
  0xc5   :  { %1485 = vmatprep.subr.bf16.mxu0 %v3608_v1  ;;  %1608 = vmatprep.subr.bf16.mxu1 %v3611_v2  ;;  %v3703_v1 = vld [vmem:[#allocation5 + $0x5cc] ss:$16 sps:$4 sm:$0xff]   ;;  %v3698_v2 = vld [vmem:[#allocation5 + $0x5c0] ss:$16 sps:$4 sm:$0xff]  }
  0xc8   :  { %1486 = vmatpush1.bf16.msra.mxu0 %v3606_v3  ;;  %1609 = vmatpush1.bf16.msra.mxu1 %v3609_v4  ;;  %v3701_v3 = vld [vmem:[#allocation5 + $0x5c8] ss:$16 sps:$4 sm:$0xff]   ;;  %v3706_v4 = vld [vmem:[#allocation5 + $0x5e4] ss:$16 sps:$4 sm:$0xff]  }
  0xc9   :  { %1496 = vmatprep.subr.bf16.mxu0 %v3616_v5  ;;  %1619 = vmatprep.subr.bf16.mxu1 %v3619_v6  ;;  %v3709_v5 = vld [vmem:[#allocation5 + $0x5ec] ss:$16 sps:$4 sm:$0xff]   ;;  %v3704_v6 = vld [vmem:[#allocation5 + $0x5e0] ss:$16 sps:$4 sm:$0xff]  }
  0xcb   :  { %1488 = vmatmul.mubr.bf16.vlgmr.msra.gmra.mrb[0].mxu0 %v2973_v7  ;;  %1611 = vmatmul.mubr.bf16.vlgmr.msra.gmra.mrb[0].mxu1 %v2973_v7  ;;  %v3707_v7 = vld [vmem:[#allocation5 + $0x5e8] ss:$16 sps:$4 sm:$0xff]  }
  0xcc   :  { %1497 = vmatpush1.bf16.msra.mxu0 %v3614_v8  ;;  %1620 = vmatpush1.bf16.msra.mxu1 %v3617_v9  ;;  %v3714_v8 = vld [vmem:[#allocation5 + $0x604] ss:$16 sps:$4 sm:$0xff]   ;;  %v3717_v9 = vld [vmem:[#allocation5 + $0x60c] ss:$16 sps:$4 sm:$0xff]  }
  0xcd   :  { %1498 = vmatprep.subr.bf16.mxu0 %v3622_v10  ;;  %1621 = vmatprep.subr.bf16.mxu1 %v3625_v12  ;;  %v3712_v10 = vld [vmem:[#allocation5 + $0x600] ss:$16 sps:$4 sm:$0xff]   ;;  %v3715_v12 = vld [vmem:[#allocation5 + $0x608] ss:$16 sps:$4 sm:$0xff]  }
  0xce   :  { %1528 = vmatprep.mubr.bf16.mxu0 %v2976_v13  ;;  %1651 = vmatprep.mubr.bf16.mxu1 %v2976_v13  ;;  %v2975_v13 = vcombine.low %v4166_v11, %v4166_v11  ;;  %v3735_v11 = vld [vmem:[#allocation5 + $0x66c] ss:$16 sps:$4 sm:$0xff]  }
  0xd0   :  { %1499 = vmatpush1.bf16.msra.mxu0 %v3620_v14  ;;  %1622 = vmatpush1.bf16.msra.mxu1 %v3623_v15  ;;  %v3720_v14 = vld [vmem:[#allocation5 + $0x624] ss:$16 sps:$4 sm:$0xff]   ;;  %v3723_v15 = vld [vmem:[#allocation5 + $0x62c] ss:$16 sps:$4 sm:$0xff]  }
  0xd1   :  { %1500 = vmatprep.subr.bf16.mxu0 %v3628_v16  ;;  %1623 = vmatprep.subr.bf16.mxu1 %v3631_v17  ;;  %v3718_v16 = vld [vmem:[#allocation5 + $0x620] ss:$16 sps:$4 sm:$0xff]   ;;  %v3721_v17 = vld [vmem:[#allocation5 + $0x628] ss:$16 sps:$4 sm:$0xff]  }
  0xd4   :  { %1501 = vmatpush1.bf16.msra.mxu0 %v3626_v18  ;;  %1624 = vmatpush1.bf16.msra.mxu1 %v3629_v19  ;;  %v3726_v18 = vld [vmem:[#allocation5 + $0x644] ss:$16 sps:$4 sm:$0xff]   ;;  %v3729_v19 = vld [vmem:[#allocation5 + $0x64c] ss:$16 sps:$4 sm:$0xff]  }
  0xd5   :  { %1502 = vmatprep.subr.bf16.mxu0 %v3634_v20  ;;  %1625 = vmatprep.subr.bf16.mxu1 %v3637_v21  ;;  %v3724_v20 = vld [vmem:[#allocation5 + $0x640] ss:$16 sps:$4 sm:$0xff]   ;;  %v3727_v21 = vld [vmem:[#allocation5 + $0x648] ss:$16 sps:$4 sm:$0xff]  }
  0xd8   :  { %1503 = vmatpush1.bf16.msra.mxu0 %v3632_v22  ;;  %1626 = vmatpush1.bf16.msra.mxu1 %v3635_v23  ;;  %v3732_v22 = vld [vmem:[#allocation5 + $0x664] ss:$16 sps:$4 sm:$0xff]   ;;  %v3730_v23 = vld [vmem:[#allocation5 + $0x660] ss:$16 sps:$4 sm:$0xff]  }
  0xd9   :  { %1504 = vmatprep.subr.bf16.mxu0 %v3640_v24  ;;  %1627 = vmatprep.subr.bf16.mxu1 %v3643_v25  ;;  %v3733_v24 = vld [vmem:[#allocation5 + $0x668] ss:$16 sps:$4 sm:$0xff]   ;;  %v3738_v25 = vld [vmem:[#allocation5 + $0x684] ss:$16 sps:$4 sm:$0xff]  }
  0xdc   :  { %1505 = vmatpush1.bf16.msra.mxu0 %v3638_v26  ;;  %1628 = vmatpush1.bf16.msra.mxu1 %v3641_v27  ;;  %v3741_v26 = vld [vmem:[#allocation5 + $0x68c] ss:$16 sps:$4 sm:$0xff]   ;;  %v3736_v27 = vld [vmem:[#allocation5 + $0x680] ss:$16 sps:$4 sm:$0xff]  }
  0xdd   :  { %1506 = vmatprep.subr.bf16.mxu0 %v3646_v28  ;;  %1629 = vmatprep.subr.bf16.mxu1 %v3649_v29  ;;  %v3739_v28 = vld [vmem:[#allocation5 + $0x688] ss:$16 sps:$4 sm:$0xff]   ;;  %v3744_v29 = vld [vmem:[#allocation5 + $0x6a4] ss:$16 sps:$4 sm:$0xff]  }
  0xe0   :  { %1507 = vmatpush1.bf16.msra.mxu0 %v3644_v30  ;;  %1630 = vmatpush1.bf16.msra.mxu1 %v3647_v31  ;;  %v3747_v30 = vld [vmem:[#allocation5 + $0x6ac] ss:$16 sps:$4 sm:$0xff]   ;;  %v3742_v31 = vld [vmem:[#allocation5 + $0x6a0] ss:$16 sps:$4 sm:$0xff]  }
  0xe1   :  { %1508 = vmatprep.subr.bf16.mxu0 %v3652_v32  ;;  %1631 = vmatprep.subr.bf16.mxu1 %v3655_v33  ;;  %v3745_v32 = vld [vmem:[#allocation5 + $0x6a8] ss:$16 sps:$4 sm:$0xff]   ;;  %v3750_v33 = vld [vmem:[#allocation5 + $0x6c4] ss:$16 sps:$4 sm:$0xff]  }
  0xe4   :  { %1509 = vmatpush1.bf16.msra.mxu0 %v3650_v34  ;;  %1632 = vmatpush1.bf16.msra.mxu1 %v3653_v35  ;;  %v3753_v34 = vld [vmem:[#allocation5 + $0x6cc] ss:$16 sps:$4 sm:$0xff]   ;;  %v3748_v35 = vld [vmem:[#allocation5 + $0x6c0] ss:$16 sps:$4 sm:$0xff]  }
  0xe5   :  { %1510 = vmatprep.subr.bf16.mxu0 %v3658_v36  ;;  %1633 = vmatprep.subr.bf16.mxu1 %v3661_v37  ;;  %v3751_v36 = vld [vmem:[#allocation5 + $0x6c8] ss:$16 sps:$4 sm:$0xff]   ;;  %v3756_v37 = vld [vmem:[#allocation5 + $0x6e4] ss:$16 sps:$4 sm:$0xff]  }
  0xe8   :  { %1511 = vmatpush1.bf16.msra.mxu0 %v3656_v38  ;;  %1634 = vmatpush1.bf16.msra.mxu1 %v3659_v39  ;;  %v3759_v38 = vld [vmem:[#allocation5 + $0x6ec] ss:$16 sps:$4 sm:$0xff]   ;;  %v3754_v39 = vld [vmem:[#allocation5 + $0x6e0] ss:$16 sps:$4 sm:$0xff]  }
  0xe9   :  { %1512 = vmatprep.subr.bf16.mxu0 %v3664_v40  ;;  %1635 = vmatprep.subr.bf16.mxu1 %v3667_v41  ;;  %v3757_v40 = vld [vmem:[#allocation5 + $0x6e8] ss:$16 sps:$4 sm:$0xff]   ;;  %v3762_v41 = vld [vmem:[#allocation5 + $0x704] ss:$16 sps:$4 sm:$0xff]  }
  0xec   :  { %1513 = vmatpush1.bf16.msra.mxu0 %v3662_v42  ;;  %1636 = vmatpush1.bf16.msra.mxu1 %v3665_v43  ;;  %v3765_v42 = vld [vmem:[#allocation5 + $0x70c] ss:$16 sps:$4 sm:$0xff]   ;;  %v3760_v43 = vld [vmem:[#allocation5 + $0x700] ss:$16 sps:$4 sm:$0xff]  }
  0xed   :  { %1514 = vmatprep.subr.bf16.mxu0 %v3670_v44  ;;  %1637 = vmatprep.subr.bf16.mxu1 %v3673_v45  ;;  %v3763_v44 = vld [vmem:[#allocation5 + $0x708] ss:$16 sps:$4 sm:$0xff]   ;;  %v3768_v45 = vld [vmem:[#allocation5 + $0x724] ss:$16 sps:$4 sm:$0xff]  }
  0xf0   :  { %1515 = vmatpush1.bf16.msra.mxu0 %v3668_v46  ;;  %1638 = vmatpush1.bf16.msra.mxu1 %v3671_v47  ;;  %v3771_v46 = vld [vmem:[#allocation5 + $0x72c] ss:$16 sps:$4 sm:$0xff]   ;;  %v3766_v47 = vld [vmem:[#allocation5 + $0x720] ss:$16 sps:$4 sm:$0xff]  }
  0xf1   :  { %1516 = vmatprep.subr.bf16.mxu0 %v3676_v48  ;;  %1639 = vmatprep.subr.bf16.mxu1 %v3679_v49  ;;  %v3769_v48 = vld [vmem:[#allocation5 + $0x728] ss:$16 sps:$4 sm:$0xff]   ;;  %v3774_v49 = vld [vmem:[#allocation5 + $0x744] ss:$16 sps:$4 sm:$0xff]  }
  0xf4   :  { %1517 = vmatpush1.bf16.msra.mxu0 %v3674_v50  ;;  %1640 = vmatpush1.bf16.msra.mxu1 %v3677_v51  ;;  %v3777_v50 = vld [vmem:[#allocation5 + $0x74c] ss:$16 sps:$4 sm:$0xff]   ;;  %v3772_v51 = vld [vmem:[#allocation5 + $0x740] ss:$16 sps:$4 sm:$0xff]  }
  0xf5   :  { %1518 = vmatprep.subr.bf16.mxu0 %v3682_v52  ;;  %1641 = vmatprep.subr.bf16.mxu1 %v3685_v53  ;;  %v3775_v52 = vld [vmem:[#allocation5 + $0x748] ss:$16 sps:$4 sm:$0xff]   ;;  %v3780_v53 = vld [vmem:[#allocation5 + $0x764] ss:$16 sps:$4 sm:$0xff]  }
  0xf8   :  { %1519 = vmatpush1.bf16.msra.mxu0 %v3680_v54  ;;  %1642 = vmatpush1.bf16.msra.mxu1 %v3683_v55  ;;  %v3783_v54 = vld [vmem:[#allocation5 + $0x76c] ss:$16 sps:$4 sm:$0xff]   ;;  %v3778_v55 = vld [vmem:[#allocation5 + $0x760] ss:$16 sps:$4 sm:$0xff]  }
  0xf9   :  { %1520 = vmatprep.subr.bf16.mxu0 %v3688_v56  ;;  %1643 = vmatprep.subr.bf16.mxu1 %v3691_v57  ;;  %v3781_v56 = vld [vmem:[#allocation5 + $0x768] ss:$16 sps:$4 sm:$0xff]   ;;  %v3786_v57 = vld [vmem:[#allocation5 + $0x784] ss:$16 sps:$4 sm:$0xff]  }
  0xfc   :  { %1521 = vmatpush1.bf16.msra.mxu0 %v3686_v58  ;;  %1644 = vmatpush1.bf16.msra.mxu1 %v3689_v59  ;;  %v3789_v58 = vld [vmem:[#allocation5 + $0x78c] ss:$16 sps:$4 sm:$0xff]   ;;  %v3784_v59 = vld [vmem:[#allocation5 + $0x780] ss:$16 sps:$4 sm:$0xff]  }
  0xfd   :  { %1522 = vmatprep.subr.bf16.mxu0 %v3694_v60  ;;  %1645 = vmatprep.subr.bf16.mxu1 %v3697_v61  ;;  %v3787_v60 = vld [vmem:[#allocation5 + $0x788] ss:$16 sps:$4 sm:$0xff]   ;;  %v3792_v61 = vld [vmem:[#allocation5 + $0x7a4] ss:$16 sps:$4 sm:$0xff]  }
 0x100   :  { %1523 = vmatpush1.bf16.msra.mxu0 %v3692_v62  ;;  %1646 = vmatpush1.bf16.msra.mxu1 %v3695_v63  ;;  %v3795_v62 = vld [vmem:[#allocation5 + $0x7ac] ss:$16 sps:$4 sm:$0xff]   ;;  %v3790_v63 = vld [vmem:[#allocation5 + $0x7a0] ss:$16 sps:$4 sm:$0xff]  }
 0x101   :  { %1524 = vmatprep.subr.bf16.mxu0 %v3700_v0  ;;  %1647 = vmatprep.subr.bf16.mxu1 %v3703_v1  ;;  %v3793_v0 = vld [vmem:[#allocation5 + $0x7a8] ss:$16 sps:$4 sm:$0xff]   ;;  %v3798_v1 = vld [vmem:[#allocation5 + $0x7c4] ss:$16 sps:$4 sm:$0xff]  }
 0x104   :  { %1525 = vmatpush1.bf16.msra.mxu0 %v3698_v2  ;;  %1648 = vmatpush1.bf16.msra.mxu1 %v3701_v3  ;;  %v3801_v2 = vld [vmem:[#allocation5 + $0x7cc] ss:$16 sps:$4 sm:$0xff]   ;;  %v3796_v3 = vld [vmem:[#allocation5 + $0x7c0] ss:$16 sps:$4 sm:$0xff]  }
 0x105   :  { %1526 = vmatprep.subr.bf16.mxu0 %v3706_v4  ;;  %1649 = vmatprep.subr.bf16.mxu1 %v3709_v5  ;;  %v3799_v4 = vld [vmem:[#allocation5 + $0x7c8] ss:$16 sps:$4 sm:$0xff]   ;;  %v3804_v5 = vld [vmem:[#allocation5 + $0x7e4] ss:$16 sps:$4 sm:$0xff]  }
 0x108   :  { %1527 = vmatpush1.bf16.msra.mxu0 %v3704_v6  ;;  %1650 = vmatpush1.bf16.msra.mxu1 %v3707_v7  ;;  %v3807_v6 = vld [vmem:[#allocation5 + $0x7ec] ss:$16 sps:$4 sm:$0xff]   ;;  %v3802_v7 = vld [vmem:[#allocation5 + $0x7e0] ss:$16 sps:$4 sm:$0xff]  }
 0x109   :  { %2340 = vmatprep.subr.bf16.mxu0 %v3714_v8  ;;  %2422 = vmatprep.subr.bf16.mxu1 %v3717_v9  ;;  %v3805_v8 = vld [vmem:[#allocation5 + $0x7e8] ss:$16 sps:$4 sm:$0xff]   ;;  %v3810_v9 = vld [vmem:[#allocation5 + $0x804] ss:$16 sps:$4 sm:$0xff]  }
 0x10b   :  { %1529 = vmatmul.mubr.bf16.vlgmr.msra.gmra.mrb[0].mxu0 %v2975_v13  ;;  %1652 = vmatmul.mubr.bf16.vlgmr.msra.gmra.mrb[0].mxu1 %v2975_v13 }
 0x10c   :  { %2341 = vmatpush1.bf16.msra.mxu0 %v3712_v10  ;;  %2423 = vmatpush1.bf16.msra.mxu1 %v3715_v12  ;;  %v3813_v10 = vld [vmem:[#allocation5 + $0x80c] ss:$16 sps:$4 sm:$0xff]   ;;  %v397_v12 = vlaneseq }
 0x10d   :  { %2342 = vmatprep.subr.bf16.mxu0 %v3720_v14  ;;  %2424 = vmatprep.subr.bf16.mxu1 %v3723_v15  ;;  %v4177_v15 = vld [vmem:[#allocation7] sm:$0x77] }
 0x10e   :  { %v4172_v13 = vshrl.u32 %v397_v12, 7  ;;  %v3870_v12 = vld [vmem:[#allocation5 + $0x944] ss:$16 sps:$4 sm:$0xff]  }
 0x110   :  { %2343 = vmatpush1.bf16.msra.mxu0 %v3718_v16  ;;  %2425 = vmatpush1.bf16.msra.mxu1 %v3721_v17  ;;  %v4175_v14 = vsub.s32 0, %v4172_v13  ;;  %v403_v16 = vsub.s32 4, %v4172_v13  ;;  %v4180_v17 = vld [vmem:[#allocation7 + $0x8] sm:$0x77] }
 0x111   :  { %2344 = vmatprep.subr.bf16.mxu0 %v3726_v18  ;;  %2426 = vmatprep.subr.bf16.mxu1 %v3729_v19 }
 0x112   :  { %v400_v18 = vrot.slane %v4177_v15, %v4175_v14  ;;  %v404_v19 = vrot.slane %v4177_v15, %v403_v16 }
 0x114   :  { %2345 = vmatpush1.bf16.msra.mxu0 %v3724_v20  ;;  %2427 = vmatpush1.bf16.msra.mxu1 %v3727_v21  ;;  %v412_v20 = vrot.slane %v4180_v17, %v403_v16  ;;  %v420_v21 = vrot.slane %v400_v18, %v4175_v14  ;;  %v3873_v16 = vld [vmem:[#allocation5 + $0x94c] ss:$16 sps:$4 sm:$0xff]   ;;  %v3868_v18 = vld [vmem:[#allocation5 + $0x940] ss:$16 sps:$4 sm:$0xff]  }
 0x115   :  { %2346 = vmatprep.subr.bf16.mxu0 %v3732_v22  ;;  %2428 = vmatprep.subr.bf16.mxu1 %v3735_v11  ;;  %v424_v22 = vrot.slane %v404_v19, %v4175_v14  ;;  %v3871_v19 = vld [vmem:[#allocation5 + $0x948] ss:$16 sps:$4 sm:$0xff]  }
 0x116   :  { %v432_v11 = vrot.slane %v412_v20, %v4175_v14  ;;  %v3876_v20 = vld [vmem:[#allocation5 + $0x964] ss:$16 sps:$4 sm:$0xff]  }
 0x118   :  { %2347 = vmatpush1.bf16.msra.mxu0 %v3730_v23  ;;  %2429 = vmatpush1.bf16.msra.mxu1 %v3733_v24 }
 0x119   :  { %2348 = vmatprep.subr.bf16.mxu0 %v3738_v25  ;;  %2430 = vmatprep.subr.bf16.mxu1 %v3741_v26 }
 0x11c   :  { %2349 = vmatpush1.bf16.msra.mxu0 %v3736_v27  ;;  %2431 = vmatpush1.bf16.msra.mxu1 %v3739_v28 }
 0x11d   :  { %2350 = vmatprep.subr.bf16.mxu0 %v3744_v29  ;;  %2432 = vmatprep.subr.bf16.mxu1 %v3747_v30 }
 0x120   :  { %2351 = vmatpush1.bf16.msra.mxu0 %v3742_v31  ;;  %2433 = vmatpush1.bf16.msra.mxu1 %v3745_v32 }
 0x121   :  { %2352 = vmatprep.subr.bf16.mxu0 %v3750_v33  ;;  %2434 = vmatprep.subr.bf16.mxu1 %v3753_v34 }
 0x124   :  { %2353 = vmatpush1.bf16.msra.mxu0 %v3748_v35  ;;  %2435 = vmatpush1.bf16.msra.mxu1 %v3751_v36  ;;  %v3808_v35 = vld [vmem:[#allocation5 + $0x800] ss:$16 sps:$4 sm:$0xff]   ;;  %v3811_v36 = vld [vmem:[#allocation5 + $0x808] ss:$16 sps:$4 sm:$0xff]  }
 0x125   :  { %2354 = vmatprep.subr.bf16.mxu0 %v3756_v37  ;;  %2436 = vmatprep.subr.bf16.mxu1 %v3759_v38  ;;  %v3816_v38 = vld [vmem:[#allocation5 + $0x824] ss:$16 sps:$4 sm:$0xff]  }
 0x128   :  { %2355 = vmatpush1.bf16.msra.mxu0 %v3754_v39  ;;  %2437 = vmatpush1.bf16.msra.mxu1 %v3757_v40  ;;  %v3819_v39 = vld [vmem:[#allocation5 + $0x82c] ss:$16 sps:$4 sm:$0xff]  }
 0x129   :  { %2356 = vmatprep.subr.bf16.mxu0 %v3762_v41  ;;  %2438 = vmatprep.subr.bf16.mxu1 %v3765_v42  ;;  %v3814_v41 = vld [vmem:[#allocation5 + $0x820] ss:$16 sps:$4 sm:$0xff]   ;;  %v3817_v42 = vld [vmem:[#allocation5 + $0x828] ss:$16 sps:$4 sm:$0xff]  }
 0x12c   :  { %2357 = vmatpush1.bf16.msra.mxu0 %v3760_v43  ;;  %2439 = vmatpush1.bf16.msra.mxu1 %v3763_v44  ;;  %v3822_v43 = vld [vmem:[#allocation5 + $0x844] ss:$16 sps:$4 sm:$0xff]   ;;  %v3825_v44 = vld [vmem:[#allocation5 + $0x84c] ss:$16 sps:$4 sm:$0xff]  }
 0x12d   :  { %2358 = vmatprep.subr.bf16.mxu0 %v3768_v45  ;;  %2440 = vmatprep.subr.bf16.mxu1 %v3771_v46  ;;  %v3820_v45 = vld [vmem:[#allocation5 + $0x840] ss:$16 sps:$4 sm:$0xff]   ;;  %v3823_v46 = vld [vmem:[#allocation5 + $0x848] ss:$16 sps:$4 sm:$0xff]  }
 0x130   :  { %2359 = vmatpush1.bf16.msra.mxu0 %v3766_v47  ;;  %2441 = vmatpush1.bf16.msra.mxu1 %v3769_v48  ;;  %v3828_v47 = vld [vmem:[#allocation5 + $0x864] ss:$16 sps:$4 sm:$0xff]   ;;  %v3831_v48 = vld [vmem:[#allocation5 + $0x86c] ss:$16 sps:$4 sm:$0xff]  }
 0x131   :  { %2360 = vmatprep.subr.bf16.mxu0 %v3774_v49  ;;  %2442 = vmatprep.subr.bf16.mxu1 %v3777_v50  ;;  %v3826_v49 = vld [vmem:[#allocation5 + $0x860] ss:$16 sps:$4 sm:$0xff]   ;;  %v3829_v50 = vld [vmem:[#allocation5 + $0x868] ss:$16 sps:$4 sm:$0xff]  }
 0x134   :  { %2361 = vmatpush1.bf16.msra.mxu0 %v3772_v51  ;;  %2443 = vmatpush1.bf16.msra.mxu1 %v3775_v52  ;;  %v3834_v51 = vld [vmem:[#allocation5 + $0x884] ss:$16 sps:$4 sm:$0xff]   ;;  %v3837_v52 = vld [vmem:[#allocation5 + $0x88c] ss:$16 sps:$4 sm:$0xff]  }
 0x135   :  { %2362 = vmatprep.subr.bf16.mxu0 %v3780_v53  ;;  %2444 = vmatprep.subr.bf16.mxu1 %v3783_v54  ;;  %v3832_v53 = vld [vmem:[#allocation5 + $0x880] ss:$16 sps:$4 sm:$0xff]   ;;  %v3835_v54 = vld [vmem:[#allocation5 + $0x888] ss:$16 sps:$4 sm:$0xff]  }
 0x138   :  { %2363 = vmatpush1.bf16.msra.mxu0 %v3778_v55  ;;  %2445 = vmatpush1.bf16.msra.mxu1 %v3781_v56  ;;  %v3840_v55 = vld [vmem:[#allocation5 + $0x8a4] ss:$16 sps:$4 sm:$0xff]   ;;  %v3843_v56 = vld [vmem:[#allocation5 + $0x8ac] ss:$16 sps:$4 sm:$0xff]  }
 0x139   :  { %2364 = vmatprep.subr.bf16.mxu0 %v3786_v57  ;;  %2446 = vmatprep.subr.bf16.mxu1 %v3789_v58  ;;  %v3838_v57 = vld [vmem:[#allocation5 + $0x8a0] ss:$16 sps:$4 sm:$0xff]   ;;  %v3841_v58 = vld [vmem:[#allocation5 + $0x8a8] ss:$16 sps:$4 sm:$0xff]  }
 0x13c   :  { %2365 = vmatpush1.bf16.msra.mxu0 %v3784_v59  ;;  %2447 = vmatpush1.bf16.msra.mxu1 %v3787_v60  ;;  %v3846_v59 = vld [vmem:[#allocation5 + $0x8c4] ss:$16 sps:$4 sm:$0xff]   ;;  %v3849_v60 = vld [vmem:[#allocation5 + $0x8cc] ss:$16 sps:$4 sm:$0xff]  }
 0x13d   :  { %2366 = vmatprep.subr.bf16.mxu0 %v3792_v61  ;;  %2448 = vmatprep.subr.bf16.mxu1 %v3795_v62  ;;  %v3844_v61 = vld [vmem:[#allocation5 + $0x8c0] ss:$16 sps:$4 sm:$0xff]   ;;  %v3847_v62 = vld [vmem:[#allocation5 + $0x8c8] ss:$16 sps:$4 sm:$0xff]  }
 0x140   :  { %2367 = vmatpush1.bf16.msra.mxu0 %v3790_v63  ;;  %2449 = vmatpush1.bf16.msra.mxu1 %v3793_v0  ;;  %v3852_v63 = vld [vmem:[#allocation5 + $0x8e4] ss:$16 sps:$4 sm:$0xff]   ;;  %v3855_v0 = vld [vmem:[#allocation5 + $0x8ec] ss:$16 sps:$4 sm:$0xff]  }
 0x141   :  { %2368 = vmatprep.subr.bf16.mxu0 %v3798_v1  ;;  %2450 = vmatprep.subr.bf16.mxu1 %v3801_v2  ;;  %v3850_v1 = vld [vmem:[#allocation5 + $0x8e0] ss:$16 sps:$4 sm:$0xff]   ;;  %v3853_v2 = vld [vmem:[#allocation5 + $0x8e8] ss:$16 sps:$4 sm:$0xff]  }
 0x144   :  { %2369 = vmatpush1.bf16.msra.mxu0 %v3796_v3  ;;  %2451 = vmatpush1.bf16.msra.mxu1 %v3799_v4  ;;  %v3858_v3 = vld [vmem:[#allocation5 + $0x904] ss:$16 sps:$4 sm:$0xff]   ;;  %v3861_v4 = vld [vmem:[#allocation5 + $0x90c] ss:$16 sps:$4 sm:$0xff]  }
 0x145   :  { %2370 = vmatprep.subr.bf16.mxu0 %v3804_v5  ;;  %2452 = vmatprep.subr.bf16.mxu1 %v3807_v6  ;;  %v3856_v5 = vld [vmem:[#allocation5 + $0x900] ss:$16 sps:$4 sm:$0xff]   ;;  %v3859_v6 = vld [vmem:[#allocation5 + $0x908] ss:$16 sps:$4 sm:$0xff]  }
 0x148   :  { %2371 = vmatpush1.bf16.msra.mxu0 %v3802_v7  ;;  %2453 = vmatpush1.bf16.msra.mxu1 %v3805_v8  ;;  %v3864_v7 = vld [vmem:[#allocation5 + $0x924] ss:$16 sps:$4 sm:$0xff]   ;;  %v3867_v8 = vld [vmem:[#allocation5 + $0x92c] ss:$16 sps:$4 sm:$0xff]  }
 0x149   :  { %2381 = vmatprep.subr.bf16.mxu0 %v3810_v9  ;;  %2463 = vmatprep.subr.bf16.mxu1 %v3813_v10  ;;  %v3862_v9 = vld [vmem:[#allocation5 + $0x920] ss:$16 sps:$4 sm:$0xff]   ;;  %v3865_v10 = vld [vmem:[#allocation5 + $0x928] ss:$16 sps:$4 sm:$0xff]  }
 0x1de   :  { %v1530_v23 = vpop.f32.mrb[0].mxu0  ;;  %v4189_v24 = vpop.f32.mrb[0].mxu1 }
 0x1df   :  { %v4191_v25 = vadd.f32 %v1530_v23, %v420_v21  ;;  %v1532_v26 = vpop.f32.mrb[1].mxu0  ;;  %v1655_v27 = vpop.f32.mrb[1].mxu1  ;;  %v3879_v21 = vld [vmem:[#allocation5 + $0x96c] ss:$16 sps:$4 sm:$0xff]   ;;  %v3882_v23 = vld [vmem:[#allocation5 + $0x984] ss:$16 sps:$4 sm:$0xff]  }
 0x1e0   :  { %v4193_v28 = vadd.f32 %v1532_v26, %v424_v22  ;;  %v1534_v29 = vpop.f32.mrb[2].mxu0  ;;  %v1657_v30 = vpop.f32.mrb[2].mxu1  ;;  %v4195_v31 = vadd.f32 %v1655_v27, %v432_v11  ;;  %v3874_v22 = vld [vmem:[#allocation5 + $0x960] ss:$16 sps:$4 sm:$0xff]   ;;  %v3877_v11 = vld [vmem:[#allocation5 + $0x968] ss:$16 sps:$4 sm:$0xff]  }
 0x1e1   :  { %v1535_v32 = vpop.f32.mrb[3].mxu0  ;;  %v1658_v33 = vpop.f32.mrb[3].mxu1  ;;  %v1660_v37 = vpack.c.bf16 %v4191_v25, %v4191_v25  ;;  %v3885_v26 = vld [vmem:[#allocation5 + $0x98c] ss:$16 sps:$4 sm:$0xff]   ;;  %v3880_v27 = vld [vmem:[#allocation5 + $0x980] ss:$16 sps:$4 sm:$0xff]  }
 0x1e2   :  { %v1661_v34 = vpack.c.bf16 %v4193_v28, %v4193_v28  ;;  %v1663_v40 = vpack.c.bf16 %v4195_v31, %v4195_v31  ;;  %v3883_v29 = vld [vmem:[#allocation5 + $0x988] ss:$16 sps:$4 sm:$0xff]   ;;  %v3888_v30 = vld [vmem:[#allocation5 + $0x9a4] ss:$16 sps:$4 sm:$0xff]   ;;  %v3891_v32 = vld [vmem:[#allocation5 + $0x9ac] ss:$16 sps:$4 sm:$0xff]  }
 0x1e3   :  { %v3886_v33 = vld [vmem:[#allocation5 + $0x9a0] ss:$16 sps:$4 sm:$0xff]  }
 0x1e4   :  { %2372 = vmatprep.mubr.bf16.mxu0 %v1661_v34  ;;  %2454 = vmatprep.mubr.bf16.mxu1 %v1661_v34  ;;  %v3889_v34 = vld [vmem:[#allocation5 + $0x9a8] ss:$16 sps:$4 sm:$0xff]  }
 0x1e5   :  { %2373 = vmatmul.mubr.bf16.vlgmr.msra.gmra.mrb[4].mxu0 %v1660_v37  ;;  %2455 = vmatmul.mubr.bf16.vlgmr.msra.gmra.mrb[4].mxu1 %v1660_v37  ;;  %v3897_v37 = vld [vmem:[#allocation5 + $0x9cc] ss:$16 sps:$4 sm:$0xff]  }
 0x1e6   :  { %2382 = vmatpush1.bf16.msra.mxu0 %v3808_v35  ;;  %2464 = vmatpush1.bf16.msra.mxu1 %v3811_v36  ;;  %v408_v35 = vrot.slane %v4180_v17, %v4175_v14  ;;  %v3894_v36 = vld [vmem:[#allocation5 + $0x9c4] ss:$16 sps:$4 sm:$0xff]  }
 0x1e7   :  { %2413 = vmatprep.mubr.bf16.mxu0 %v1663_v40  ;;  %2495 = vmatprep.mubr.bf16.mxu1 %v1663_v40 }
 0x1e8   :  { %2383 = vmatprep.subr.bf16.mxu0 %v3816_v38  ;;  %2465 = vmatprep.subr.bf16.mxu1 %v3819_v39  ;;  %v3892_v38 = vld [vmem:[#allocation5 + $0x9c0] ss:$16 sps:$4 sm:$0xff]   ;;  %v3895_v39 = vld [vmem:[#allocation5 + $0x9c8] ss:$16 sps:$4 sm:$0xff]   ;;  %v428_v40 = vrot.slane %v408_v35, %v4175_v14 }
 0x1e9   :  { %v3904_v14 = vld [vmem:[#allocation8 + $0x40] sm:$0xff]  }
 0x1ea   :  { %2384 = vmatpush1.bf16.msra.mxu0 %v3814_v41  ;;  %2466 = vmatpush1.bf16.msra.mxu1 %v3817_v42  ;;  %v3900_v41 = vld [vmem:[#allocation5 + $0x9e4] ss:$16 sps:$4 sm:$0xff]   ;;  %v3903_v42 = vld [vmem:[#allocation5 + $0x9ec] ss:$16 sps:$4 sm:$0xff]  }
 0x1eb   :  { %2385 = vmatprep.subr.bf16.mxu0 %v3822_v43  ;;  %2467 = vmatprep.subr.bf16.mxu1 %v3825_v44  ;;  %v3898_v43 = vld [vmem:[#allocation5 + $0x9e0] ss:$16 sps:$4 sm:$0xff]   ;;  %v3901_v44 = vld [vmem:[#allocation5 + $0x9e8] ss:$16 sps:$4 sm:$0xff]  }
 0x1ee   :  { %2386 = vmatpush1.bf16.msra.mxu0 %v3820_v45  ;;  %2468 = vmatpush1.bf16.msra.mxu1 %v3823_v46  ;;  %v4207_v45 = vadd.f32 %v4189_v24, %v428_v40  ;;  %v3910_v24 = vld [vmem:[#allocation8 + $0x8] sm:$0xff]  }
 0x1ef   :  { %2387 = vmatprep.subr.bf16.mxu0 %v3828_v47  ;;  %2469 = vmatprep.subr.bf16.mxu1 %v3831_v48  ;;  %v3905_v47 = vld [vmem:[#allocation8 + $0xc0] sm:$0xff]  }
 0x1f0   :  { %v1662_v46 = vpack.c.bf16 %v4207_v45, %v4207_v45  ;;  %v3906_v48 = vld [vmem:[#allocation8] sm:$0xff]  }
 0x1f2   :  { %2388 = vmatpush1.bf16.msra.mxu0 %v3826_v49  ;;  %2470 = vmatpush1.bf16.msra.mxu1 %v3829_v50  ;;  %v3907_v49 = vld [vmem:[#allocation8 + $0x80] sm:$0xff]   ;;  %v3908_v50 = vld [vmem:[#allocation8 + $0x48] sm:$0xff]  }
 0x1f3   :  { %2389 = vmatprep.subr.bf16.mxu0 %v3834_v51  ;;  %2471 = vmatprep.subr.bf16.mxu1 %v3837_v52  ;;  %v3909_v51 = vld [vmem:[#allocation8 + $0xc8] sm:$0xff]  }
 0x1f4   :  { %v3911_v52 = vld [vmem:[#allocation8 + $0x88] sm:$0xff]  }
 0x1f6   :  { %2390 = vmatpush1.bf16.msra.mxu0 %v3832_v53  ;;  %2472 = vmatpush1.bf16.msra.mxu1 %v3835_v54  ;;  %v3912_v53 = vld [vmem:[#allocation8 + $0x50] sm:$0xff]  }
 0x1f7   :  { %2391 = vmatprep.subr.bf16.mxu0 %v3840_v55  ;;  %2473 = vmatprep.subr.bf16.mxu1 %v3843_v56  ;;  %v3913_v54 = vld [vmem:[#allocation8 + $0xd0] sm:$0xff]  }
 0x1f8   :  { %v3914_v55 = vld [vmem:[#allocation8 + $0x10] sm:$0xff]  }
 0x1f9   :  { %v3915_v56 = vld [vmem:[#allocation8 + $0x90] sm:$0xff]  }
 0x1fa   :  { %2392 = vmatpush1.bf16.msra.mxu0 %v3838_v57  ;;  %2474 = vmatpush1.bf16.msra.mxu1 %v3841_v58  ;;  %v3916_v57 = vld [vmem:[#allocation8 + $0x58] sm:$0xff]  }
 0x1fb   :  { %2393 = vmatprep.subr.bf16.mxu0 %v3846_v59  ;;  %2475 = vmatprep.subr.bf16.mxu1 %v3849_v60  ;;  %v3917_v58 = vld [vmem:[#allocation8 + $0xd8] sm:$0xff]  }
 0x1fc   :  { %v3918_v59 = vld [vmem:[#allocation8 + $0x18] sm:$0xff]  }
 0x1fd   :  { %v3919_v60 = vld [vmem:[#allocation8 + $0x98] sm:$0xff]  }
 0x1fe   :  { %2394 = vmatpush1.bf16.msra.mxu0 %v3844_v61  ;;  %2476 = vmatpush1.bf16.msra.mxu1 %v3847_v62  ;;  %v3920_v61 = vld [vmem:[#allocation8 + $0x60] sm:$0xff]  }
 0x1ff   :  { %2395 = vmatprep.subr.bf16.mxu0 %v3852_v63  ;;  %2477 = vmatprep.subr.bf16.mxu1 %v3855_v0  ;;  %v3921_v62 = vld [vmem:[#allocation8 + $0xe0] sm:$0xff]  }
 0x200   :  { %v3922_v63 = vld [vmem:[#allocation8 + $0x20] sm:$0xff]  }
 0x201   :  { %v3923_v0 = vld [vmem:[#allocation8 + $0xa0] sm:$0xff]  }
 0x202   :  { %2396 = vmatpush1.bf16.msra.mxu0 %v3850_v1  ;;  %2478 = vmatpush1.bf16.msra.mxu1 %v3853_v2  ;;  %v3924_v1 = vld [vmem:[#allocation8 + $0x68] sm:$0xff]  }
 0x203   :  { %2397 = vmatprep.subr.bf16.mxu0 %v3858_v3  ;;  %2479 = vmatprep.subr.bf16.mxu1 %v3861_v4  ;;  %v3925_v2 = vld [vmem:[#allocation8 + $0xe8] sm:$0xff]  }
 0x204   :  { %v3926_v3 = vld [vmem:[#allocation8 + $0x28] sm:$0xff]  }
 0x205   :  { %v3927_v4 = vld [vmem:[#allocation8 + $0xa8] sm:$0xff]  }
 0x206   :  { %2398 = vmatpush1.bf16.msra.mxu0 %v3856_v5  ;;  %2480 = vmatpush1.bf16.msra.mxu1 %v3859_v6  ;;  %v3928_v5 = vld [vmem:[#allocation8 + $0x70] sm:$0xff]  }
 0x207   :  { %2399 = vmatprep.subr.bf16.mxu0 %v3864_v7  ;;  %2481 = vmatprep.subr.bf16.mxu1 %v3867_v8  ;;  %v3929_v6 = vld [vmem:[#allocation8 + $0xf0] sm:$0xff]  }
 0x208   :  { %v3930_v7 = vld [vmem:[#allocation8 + $0x30] sm:$0xff]  }
 0x209   :  { %v3931_v8 = vld [vmem:[#allocation8 + $0xb0] sm:$0xff]  }
 0x20a   :  { %2400 = vmatpush1.bf16.msra.mxu0 %v3862_v9  ;;  %2482 = vmatpush1.bf16.msra.mxu1 %v3865_v10  ;;  %v3932_v9 = vld [vmem:[#allocation8 + $0x78] sm:$0xff]  }
 0x20b   :  { %2401 = vmatprep.subr.bf16.mxu0 %v3870_v12  ;;  %2483 = vmatprep.subr.bf16.mxu1 %v3873_v16  ;;  %v3933_v10 = vld [vmem:[#allocation8 + $0xf8] sm:$0xff]  }
 0x20c   :  { %v3934_v12 = vld [vmem:[#allocation8 + $0x38] sm:$0xff]  }
 0x20d   :  { %v3935_v16 = vld [vmem:[#allocation8 + $0xb8] sm:$0xff]  }
 0x20e   :  { %2402 = vmatpush1.bf16.msra.mxu0 %v3868_v18  ;;  %2484 = vmatpush1.bf16.msra.mxu1 %v3871_v19  ;;  %v1666_v18 = vsub.s32 1, %v4172_v13  ;;  %v1670_v19 = vsub.s32 5, %v4172_v13 }
 0x20f   :  { %2403 = vmatprep.subr.bf16.mxu0 %v3876_v20  ;;  %2485 = vmatprep.subr.bf16.mxu1 %v3879_v21 }
 0x210   :  { %v1667_v20 = vrot.slane %v4177_v15, %v1666_v18  ;;  %v1675_v21 = vrot.slane %v4180_v17, %v1666_v18 }
 0x212   :  { %2404 = vmatpush1.bf16.msra.mxu0 %v3874_v22  ;;  %2486 = vmatpush1.bf16.msra.mxu1 %v3877_v11  ;;  %v1671_v22 = vrot.slane %v4177_v15, %v1670_v19  ;;  %v1679_v11 = vrot.slane %v4180_v17, %v1670_v19 }
 0x213   :  { %2405 = vmatprep.subr.bf16.mxu0 %v3882_v23  ;;  %2487 = vmatprep.subr.bf16.mxu1 %v3885_v26  ;;  %v1687_v23 = vrot.slane %v1667_v20, %v1666_v18  ;;  %v1695_v26 = vrot.slane %v1675_v21, %v1666_v18 }
 0x216   :  { %2406 = vmatpush1.bf16.msra.mxu0 %v3880_v27  ;;  %2488 = vmatpush1.bf16.msra.mxu1 %v3883_v29  ;;  %v1691_v27 = vrot.slane %v1671_v22, %v1666_v18  ;;  %v1699_v29 = vrot.slane %v1679_v11, %v1666_v18 }
 0x217   :  { %2407 = vmatprep.subr.bf16.mxu0 %v3888_v30  ;;  %2489 = vmatprep.subr.bf16.mxu1 %v3891_v32 }
 0x21a   :  { %2408 = vmatpush1.bf16.msra.mxu0 %v3886_v33  ;;  %2490 = vmatpush1.bf16.msra.mxu1 %v3889_v34 }
 0x21b   :  { %2409 = vmatprep.subr.bf16.mxu0 %v3894_v36  ;;  %2491 = vmatprep.subr.bf16.mxu1 %v3897_v37 }
 0x21e   :  { %2410 = vmatpush1.bf16.msra.mxu0 %v3892_v38  ;;  %2492 = vmatpush1.bf16.msra.mxu1 %v3895_v39 }
 0x21f   :  { %2411 = vmatprep.subr.bf16.mxu0 %v3900_v41  ;;  %2493 = vmatprep.subr.bf16.mxu1 %v3903_v42 }
 0x222   :  { %2412 = vmatpush1.bf16.msra.mxu0 %v3898_v43  ;;  %2494 = vmatpush1.bf16.msra.mxu1 %v3901_v44 }
 0x223   :  { %3333 = vmatprep.subr.bf16.mxu0 %v3904_v14  ;;  %3355 = vmatprep.subr.bf16.mxu1 %v3905_v47 }
 0x225   :  { %2414 = vmatmul.mubr.bf16.vlgmr.msra.gmra.mrb[4].mxu0 %v1662_v46  ;;  %2496 = vmatmul.mubr.bf16.vlgmr.msra.gmra.mrb[4].mxu1 %v1662_v46 }
 0x226   :  { %3334 = vmatpush3.bf16.msra.mxu0 %v3906_v48  ;;  %3356 = vmatpush3.bf16.msra.mxu1 %v3907_v49 }
 0x227   :  { %3335 = vmatprep.subr.bf16.mxu0 %v3908_v50  ;;  %3357 = vmatprep.subr.bf16.mxu1 %v3909_v51 }
 0x22a   :  { %3336 = vmatpush3.bf16.msra.mxu0 %v3910_v24  ;;  %3358 = vmatpush3.bf16.msra.mxu1 %v3911_v52 }
 0x22b   :  { %3337 = vmatprep.subr.bf16.mxu0 %v3912_v53  ;;  %3359 = vmatprep.subr.bf16.mxu1 %v3913_v54 }
 0x22e   :  { %3338 = vmatpush3.bf16.msra.mxu0 %v3914_v55  ;;  %3360 = vmatpush3.bf16.msra.mxu1 %v3915_v56 }
 0x22f   :  { %3339 = vmatprep.subr.bf16.mxu0 %v3916_v57  ;;  %3361 = vmatprep.subr.bf16.mxu1 %v3917_v58 }
 0x232   :  { %3340 = vmatpush3.bf16.msra.mxu0 %v3918_v59  ;;  %3362 = vmatpush3.bf16.msra.mxu1 %v3919_v60 }
 0x233   :  { %3341 = vmatprep.subr.bf16.mxu0 %v3920_v61  ;;  %3363 = vmatprep.subr.bf16.mxu1 %v3921_v62 }
 0x236   :  { %3342 = vmatpush3.bf16.msra.mxu0 %v3922_v63  ;;  %3364 = vmatpush3.bf16.msra.mxu1 %v3923_v0 }
 0x237   :  { %3343 = vmatprep.subr.bf16.mxu0 %v3924_v1  ;;  %3365 = vmatprep.subr.bf16.mxu1 %v3925_v2 }
 0x23a   :  { %3344 = vmatpush3.bf16.msra.mxu0 %v3926_v3  ;;  %3366 = vmatpush3.bf16.msra.mxu1 %v3927_v4 }
 0x23b   :  { %3345 = vmatprep.subr.bf16.mxu0 %v3928_v5  ;;  %3367 = vmatprep.subr.bf16.mxu1 %v3929_v6 }
 0x23e   :  { %3346 = vmatpush3.bf16.msra.mxu0 %v3930_v7  ;;  %3368 = vmatpush3.bf16.msra.mxu1 %v3931_v8 }
 0x23f   :  { %3347 = vmatprep.subr.bf16.mxu0 %v3932_v9  ;;  %3369 = vmatprep.subr.bf16.mxu1 %v3933_v10 }
 0x242   :  { %3348 = vmatpush3.bf16.msra.mxu0 %v3934_v12  ;;  %3370 = vmatpush3.bf16.msra.mxu1 %v3935_v16 }
 0x2f8   :  { %v2415_v30 = vpop.f32.mrb[4].mxu0  ;;  %v2497_v32 = vpop.f32.mrb[4].mxu1 }
 0x2f9   :  { %v3381_v33 = vadd.f32 %v2415_v30, %v1687_v23  ;;  %v3383_v34 = vadd.f32 %v2497_v32, %v1695_v26  ;;  %v2417_v35 = vpop.f32.mrb[5].mxu0  ;;  %v2499_v36 = vpop.f32.mrb[5].mxu1 }
 0x2fa   :  { %v3382_v37 = vadd.f32 %v2417_v35, %v1691_v27  ;;  %v3384_v38 = vadd.f32 %v2499_v36, %v1699_v29  ;;  %v2419_v39 = vpop.f32.mrb[6].mxu0  ;;  %v2501_v40 = vpop.f32.mrb[6].mxu1 }
 0x2fb   :  { %v3297_v41 = vmul.f32 -1.442695, %v3381_v33  ;;  %v3299_v42 = vmul.f32 -1.442695, %v3383_v34  ;;  %v2420_v43 = vpop.f32.mrb[7].mxu0  ;;  %v2502_v44 = vpop.f32.mrb[7].mxu1 }
 0x2fc   :  { %v3298_v46 = vmul.f32 -1.442695, %v3382_v37  ;;  %v3300_v17 = vmul.f32 -1.442695, %v3384_v38 }
 0x2fd   :  { %3936 = vpow2.f32 %v3297_v41 }
 0x2fe   :  { %3938 = vpow2.f32 %v3299_v42 }
 0x2ff   :  { %3940 = vpow2.f32 %v3298_v46 }
 0x300   :  { %3942 = vpow2.f32 %v3300_v17 }
 0x307   :  { %v3937_v14 = vpop.eup %3936 }
 0x308   :  { %v3939_v47 = vpop.eup %3938  ;;  %v2516_v48 = vadd.f32 1.0, %v3937_v14 }
 0x309   :  { %v3941_v49 = vpop.eup %3940  ;;  %v2518_v50 = vadd.f32 1.0, %v3939_v47 }
 0x30a   :  { %v3943_v51 = vpop.eup %3942  ;;  %3944 = vrcp.f32 %v2516_v48  ;;  %v2517_v24 = vadd.f32 1.0, %v3941_v49 }
 0x30b   :  { %3946 = vrcp.f32 %v2518_v50  ;;  %v2519_v52 = vadd.f32 1.0, %v3943_v51 }
 0x30c   :  { %3948 = vrcp.f32 %v2517_v24 }
 0x30d   :  { %3950 = vrcp.f32 %v2519_v52 }
 0x314   :  { %v3945_v53 = vpop.eup %3944 }
 0x315   :  { %v3947_v54 = vpop.eup %3946  ;;  %v2528_v55 = vmul.f32 %v3945_v53, %v4191_v25 }
 0x316   :  { %v3949_v56 = vpop.eup %3948  ;;  %v2530_v57 = vmul.f32 %v3947_v54, %v4207_v45 }
 0x317   :  { %v3951_v58 = vpop.eup %3950  ;;  %v2529_v59 = vmul.f32 %v3949_v56, %v4193_v28  ;;  %v2532_v60 = vrot.slane %v2528_v55, 4 }
 0x318   :  { %v2531_v61 = vmul.f32 %v3951_v58, %v4195_v31  ;;  %v2544_v62 = vrot.slane %v2530_v57, 4 }
 0x319   :  { %v2538_v63 = vrot.slane %v2529_v59, 4  ;;  %v2533_v0 = vadd.f32 %v2532_v60, %v2528_v55 }
 0x31a   :  { %v2550_v1 = vrot.slane %v2531_v61, 4  ;;  %v2545_v2 = vadd.f32 %v2544_v62, %v2530_v57 }
 0x31b   :  { %v2539_v3 = vadd.f32 %v2538_v63, %v2529_v59  ;;  %v2534_v4 = vrot.slane %v2533_v0, 2 }
 0x31c   :  { %v2551_v5 = vadd.f32 %v2550_v1, %v2531_v61  ;;  %v2546_v6 = vrot.slane %v2545_v2, 2 }
 0x31d   :  { %v2540_v7 = vrot.slane %v2539_v3, 2  ;;  %v2535_v25 = vadd.f32 %v2534_v4, %v2533_v0 }
 0x31e   :  { %v2552_v8 = vrot.slane %v2551_v5, 2  ;;  %v2547_v9 = vadd.f32 %v2546_v6, %v2545_v2 }
 0x31f   :  { %v2541_v45 = vadd.f32 %v2540_v7, %v2539_v3  ;;  %v2536_v10 = vrot.slane %v2535_v25, 1 }
 0x320   :  { %v2553_v12 = vadd.f32 %v2552_v8, %v2551_v5  ;;  %v2548_v28 = vrot.slane %v2547_v9, 1 }
 0x321   :  { %v2542_v16 = vrot.slane %v2541_v45, 1  ;;  %v2537_v18 = vadd.f32 %v2536_v10, %v2535_v25 }
 0x322   :  { %v2554_v31 = vrot.slane %v2553_v12, 1  ;;  %v2549_v19 = vadd.f32 %v2548_v28, %v2547_v9 }
 0x323   :  { %v2543_v20 = vadd.f32 %v2542_v16, %v2541_v45  ;;  %v2557_v21 = vmul.f32 0.125, %v2537_v18  ;;  %v2679_v16 = vsub.s32 2, %v4172_v13 }
 0x324   :  { %v2555_v22 = vadd.f32 %v2554_v31, %v2553_v12  ;;  %v2559_v11 = vmul.f32 0.125, %v2549_v19 }
 0x325   :  { %v2558_v23 = vmul.f32 0.125, %v2543_v20  ;;  %v2561_v26 = vsub.f32 %v2528_v55, %v2557_v21  ;;  %v2680_v31 = vrot.slane %v4177_v15, %v2679_v16 }
 0x326   :  { %v2560_v27 = vmul.f32 0.125, %v2555_v22  ;;  %v2563_v29 = vsub.f32 %v2530_v57, %v2559_v11 }
 0x327   :  { %v2562_v30 = vsub.f32 %v2529_v59, %v2558_v23  ;;  %v2565_v32 = vmul.f32 %v2561_v26, %v2561_v26 }
 0x328   :  { %v2564_v33 = vsub.f32 %v2531_v61, %v2560_v27  ;;  %v2567_v34 = vmul.f32 %v2563_v29, %v2563_v29 }
 0x329   :  { %v2566_v35 = vmul.f32 %v2562_v30, %v2562_v30  ;;  %v2569_v36 = vrot.slane %v2565_v32, 4 }
 0x32a   :  { %v2568_v37 = vmul.f32 %v2564_v33, %v2564_v33  ;;  %v2581_v38 = vrot.slane %v2567_v34, 4 }
 0x32b   :  { %v2575_v39 = vrot.slane %v2566_v35, 4  ;;  %v2570_v40 = vadd.f32 %v2569_v36, %v2565_v32 }
 0x32c   :  { %v2587_v41 = vrot.slane %v2568_v37, 4  ;;  %v2582_v42 = vadd.f32 %v2581_v38, %v2567_v34 }
 0x32d   :  { %v2576_v43 = vadd.f32 %v2575_v39, %v2566_v35  ;;  %v2571_v44 = vrot.slane %v2570_v40, 2 }
 0x32e   :  { %v2588_v46 = vadd.f32 %v2587_v41, %v2568_v37  ;;  %v2583_v17 = vrot.slane %v2582_v42, 2 }
 0x32f   :  { %v2577_v14 = vrot.slane %v2576_v43, 2  ;;  %v2572_v47 = vadd.f32 %v2571_v44, %v2570_v40 }
 0x330   :  { %v2589_v48 = vrot.slane %v2588_v46, 2  ;;  %v2584_v49 = vadd.f32 %v2583_v17, %v2582_v42 }
 0x331   :  { %v2578_v50 = vadd.f32 %v2577_v14, %v2576_v43  ;;  %v2573_v51 = vrot.slane %v2572_v47, 1 }
 0x332   :  { %v2590_v24 = vadd.f32 %v2589_v48, %v2588_v46  ;;  %v2585_v52 = vrot.slane %v2584_v49, 1 }
 0x333   :  { %v2579_v53 = vrot.slane %v2578_v50, 1  ;;  %v2574_v54 = vadd.f32 %v2573_v51, %v2572_v47 }
 0x334   :  { %v2591_v55 = vrot.slane %v2590_v24, 1  ;;  %v2586_v56 = vadd.f32 %v2585_v52, %v2584_v49 }
 0x335   :  { %v2580_v57 = vadd.f32 %v2579_v53, %v2578_v50  ;;  %v2593_v58 = vmul.f32 0.125, %v2574_v54 }
 0x336   :  { %v2592_v59 = vadd.f32 %v2591_v55, %v2590_v24  ;;  %v2595_v60 = vmul.f32 0.125, %v2586_v56 }
 0x337   :  { %v2594_v61 = vmul.f32 0.125, %v2580_v57  ;;  %v2597_v62 = vadd.f32 1e-05, %v2593_v58 }
 0x338   :  { %v2596_v63 = vmul.f32 0.125, %v2592_v59  ;;  %v2599_v0 = vadd.f32 1e-05, %v2595_v60 }
 0x339   :  { %v2598_v1 = vadd.f32 1e-05, %v2594_v61  ;;  %3952 = vrsqrt.f32 %v2597_v62 }
 0x33a   :  { %v2600_v2 = vadd.f32 1e-05, %v2596_v63  ;;  %3954 = vrsqrt.f32 %v2599_v0 }
 0x33b   :  { %3956 = vrsqrt.f32 %v2598_v1 }
 0x33c   :  { %3958 = vrsqrt.f32 %v2600_v2 }
 0x343   :  { %v3953_v3 = vpop.eup %3952 }
 0x344   :  { %v3955_v4 = vpop.eup %3954  ;;  %v2605_v6 = vmul.f32 %v3953_v3, %v2561_v26 }
 0x345   :  { %v3957_v5 = vpop.eup %3956  ;;  %v2607_v8 = vmul.f32 %v3955_v4, %v2563_v29 }
 0x346   :  { %v3959_v7 = vpop.eup %3958  ;;  %v2606_v25 = vmul.f32 %v3957_v5, %v2562_v30  ;;  %v2609_v12 = vpack.c.bf16 %v2605_v6, %v2605_v6 }
 0x347   :  { %v2608_v9 = vmul.f32 %v3959_v7, %v2564_v33  ;;  %v2611_v28 = vpack.c.bf16 %v2607_v8, %v2607_v8 }
 0x348   :  { %v2610_v45 = vpack.c.bf16 %v2606_v25, %v2606_v25 }
 0x349   :  { %v2612_v10 = vpack.c.bf16 %v2608_v9, %v2608_v9 }
 0x34a   :  { %2905 = vmatprep.mubr.bf16.mxu0 %v2610_v45 }
 0x34b   :  { %2945 = vmatprep.mubr.bf16.mxu1 %v2612_v10  ;;  %2906 = vmatmul.mubr.bf16.vlgmr.msra.gmra.mrb[8].mxu0 %v2609_v12 }
 0x34c   :  { %2946 = vmatmul.mubr.bf16.vlgmr.msra.gmra.mrb[8].mxu1 %v2611_v28 }
 0x41e   :  { %v3349_v18 = vpop.f32.mrb[8].mxu0 }
 0x41f   :  { %v3371_v19 = vpop.f32.mrb[8].mxu1  ;;  %v3350_v20 = vpop.f32.mrb[9].mxu0 }
 0x420   :  { %v3351_v21 = vadd.f32 %v3350_v20, %v3349_v18  ;;  %v3372_v22 = vpop.f32.mrb[9].mxu1  ;;  %v3352_v11 = vpop.f32.mrb[10].mxu0 }
 0x421   :  { %v3373_v23 = vadd.f32 %v3372_v22, %v3371_v19  ;;  %v3374_v26 = vpop.f32.mrb[10].mxu1  ;;  %v3353_v27 = vpop.f32.mrb[11].mxu0 }
 0x422   :  { %v2908_v29 = vadd.f32 %v3351_v21, %v2680_v31  ;;  %v3375_v30 = vpop.f32.mrb[11].mxu1 }
 0x424   :  { %v2948_v32 = vadd.f32 %v3373_v23, %v2908_v29 }
 0x426   :  { %2953 = vst [vmem:[#allocation10] sm:$0xff] %v2948_v32 }
 0x427   :  { %4059 = shalt.err (!%p4056_p8)
}
 0x428   :  { %s4060_s15 = scalar_lea.hbm %s4239_s4, 128 }
 0x429   :  { %p4061_p9 = scmp.ne.s32.totalorder %s4239_s4, %s4060_s15  ;;  %p4064_p10 = scmp.lt.u32.totalorder %s4060_s15, %s4239_s4 }
 0x42b   :  { %p4066_p11 = pnand %p4064_p10, %p4061_p9 }
 0x42d   :  { %4069 = shalt.err (!%p4066_p11)
}
 0x42e   :  { %2963 = dma.vmem_to_hbm [thread:$0]  %s2961_s12, 128, %s4239_s4, [#allocation4]  }
 0x42f   :  { %4076 = dma.done.wait [#allocation4], 128  }
 0x430   :  { %4077 = vsyncadd [#allocation4], 4294967168 }
 0x431   :  { %2967 = vsyncpa [#allocation3], 1 }
 0x432   :  { %2968 = vsyncpa [#allocation6], 1 }
 0x433   :  { %2969 = vsyncpa [#allocation9], 1 }
 0x434   :  { %2970 = vsyncpa [#allocation4], 1 }

</bundles_post_ra>
